<compile_context>
chip_gen: v7x
topology: tpu7x:2x2x1
jax: 0.10.0
libtpu: 0.0.40
codegen_flags: <defaults>
</compile_context>

<pallas_src>
import functools

import jax
import jax.numpy as jnp
import numpy as np
from jax.experimental import pallas as pl
from jax.experimental.pallas import tpu as pltpu

EPS = 1e-5


def _resblock_kernel(x_ref, w1_ref, b1_ref, g1_ref, be1_ref,
                     w2_ref, b2_ref, g2_ref, be2_ref, mask_ref,
                     out_ref, pad2_ref,
                     *, n_img, hp, wp, h, w, cout, pad_off):
    """Whole ResBlock forward, fully resident in VMEM.

    x_ref    : (Cin, XLEN)      padded, row-flattened input; image n at n*IMG,
                                zero overhang past N*IMG
    w1_ref   : (9, Cout, Cin)   conv1 weights, leading index = dy*3+dx
    w2_ref   : (9, Cout, Cout)  conv2 weights
    b*/g*/be*: (Cout, 1)        conv bias / bn gamma / bn beta
    mask_ref : (1, COLS)        1.0 on valid output pixels of the (H, Wp) grid
    out_ref  : (Cout, COLS)     result on the flattened (H, Wp) grid per image
    pad2_ref : (Cout, PAD2_LEN) conv2's zero-haloed input (relu(bn1) at
                                lane-aligned offset pad_off)
    """
    img = hp * wp                     # flattened (padded) pixels per image
    cols = n_img * img                # lane extent of all working arrays
    inv_count = 1.0 / float(n_img * h * w)   # valid pixels for BN statistics

    def conv9(w_ref, src_ref, base):
        # 3x3 conv as 9 accumulated MXU matmuls over lane-shifted views.
        acc = None
        for tap in range(9):
            dy, dx = tap // 3, tap % 3
            s = base + dy * wp + dx
            part = jnp.dot(w_ref[tap], src_ref[:, s:s + cols],
                           preferred_element_type=jnp.float32)
            acc = part if acc is None else acc + part
        return acc

    # ---------------- conv1 (identity branch, kept in registers) -------------
    c1 = conv9(w1_ref, x_ref, 0) + b1_ref[...]                 # (Cout, cols)

    # ---------------- bn1: one-pass masked batch statistics ------------------
    m = mask_ref[...]                                          # (1, cols)
    c1m = c1 * m
    s1 = jnp.sum(c1m, axis=1, keepdims=True)                   # (Cout, 1)
    ss1 = jnp.sum(c1m * c1, axis=1, keepdims=True)
    mean1 = s1 * inv_count
    var1 = ss1 * inv_count - mean1 * mean1
    scale1 = g1_ref[...] * jax.lax.rsqrt(var1 + EPS)
    shift1 = be1_ref[...] - mean1 * scale1

    # relu(bn1); mask zeroes junk columns so they act as the spatial halo.
    r1 = jnp.maximum(c1 * scale1 + shift1, 0.0) * m            # (Cout, cols)

    # ---------------- conv2 input: aligned dense store + tiny halo zeroing ---
    pad2_ref[:, 0:pad_off] = jnp.zeros((cout, pad_off), jnp.float32)
    pad2_ref[:, pad_off:pad_off + cols] = r1
    tail = pad2_ref.shape[1] - (pad_off + cols)
    pad2_ref[:, pad_off + cols:] = jnp.zeros((cout, tail), jnp.float32)

    # ---------------- conv2: same 9-matmul scheme ----------------------------
    c2 = conv9(w2_ref, pad2_ref, pad_off - (wp + 1)) + b2_ref[...]

    # ---------------- bn2 + residual add + ReLU, single dense store ----------
    c2m = c2 * m
    s2 = jnp.sum(c2m, axis=1, keepdims=True)
    ss2 = jnp.sum(c2m * c2, axis=1, keepdims=True)
    mean2 = s2 * inv_count
    var2 = ss2 * inv_count - mean2 * mean2
    scale2 = g2_ref[...] * jax.lax.rsqrt(var2 + EPS)
    shift2 = be2_ref[...] - mean2 * scale2
    out_ref[...] = jnp.maximum(c2 * scale2 + shift2 + c1, 0.0)


@jax.jit
def resblock_forward(x_nchw, w1, b1, g1, be1, w2, b2, g2, be2):
    """Wrapper: NCHW in -> NCHW out, parameters in PyTorch layouts."""
    N, Cin, H, W = x_nchw.shape
    Cout = w1.shape[0]
    Hp, Wp = H + 2, W + 2
    IMG = Hp * Wp
    COLS = N * IMG
    XLEN = COLS + 2 * Wp + 2     # overhang so every full-width tap view is in bounds

    # relu(bn1) lives at a lane-aligned offset in the conv2 input scratch.
    PAD_OFF = ((Wp + 1 + 127) // 128) * 128
    PAD2_LEN = PAD_OFF + COLS + Wp + 1

    # Channels-major, spatially padded, row-flattened input: (Cin, XLEN).
    xpad = jnp.pad(x_nchw.astype(jnp.float32),
                   ((0, 0), (0, 0), (1, 1), (1, 1)))           # (N, Cin, Hp, Wp)
    xflat = jnp.transpose(xpad, (1, 0, 2, 3)).reshape(Cin, COLS)
    xflat = jnp.pad(xflat, ((0, 0), (0, XLEN - COLS)))

    # PyTorch conv weight (Cout, Cin, 3, 3) -> (9, Cout, Cin), tap = dy*3 + dx.
    w1t = jnp.transpose(w1, (2, 3, 0, 1)).reshape(9, Cout, Cin).astype(jnp.float32)
    w2t = jnp.transpose(w2, (2, 3, 0, 1)).reshape(9, Cout, Cout).astype(jnp.float32)

    def col(v):
        return v.reshape(Cout, 1).astype(jnp.float32)

    # Valid-pixel mask over the per-image (H, Wp) output grid, flattened to IMG.
    m2d = jnp.pad(jnp.ones((H, W), jnp.float32), ((0, 0), (0, Wp - W)))
    mimg = jnp.pad(m2d.reshape(1, H * Wp), ((0, 0), (0, IMG - H * Wp)))
    mask = jnp.tile(mimg, (1, N))                              # (1, COLS)

    kernel = functools.partial(
        _resblock_kernel, n_img=N, hp=Hp, wp=Wp, h=H, w=W,
        cout=Cout, pad_off=PAD_OFF)

    vmem = pl.BlockSpec(memory_space=pltpu.MemorySpace.VMEM)
    out_flat = pl.pallas_call(
        kernel,
        out_shape=jax.ShapeDtypeStruct((Cout, COLS), jnp.float32),
        in_specs=[vmem] * 10,
        out_specs=vmem,
        scratch_shapes=[
            pltpu.VMEM((Cout, PAD2_LEN), jnp.float32),   # conv2 zero-haloed input
        ],
    )(xflat, w1t, col(b1), col(g1), col(be1), w2t, col(b2), col(g2), col(be2), mask)

    # Un-flatten: (Cout, N*IMG) over the (H, Wp) grid -> (N, Cout, H, W).
    out = out_flat.reshape(Cout, N, IMG)[:, :, :H * Wp]
    out = out.reshape(Cout, N, H, Wp)[:, :, :, :W]
    return jnp.transpose(out, (1, 0, 2, 3))


def _reference_forward(x_nchw, w1, b1, g1, be1, w2, b2, g2, be2):
    """Pure-JAX reference mirroring the PyTorch module (training-mode BN)."""
    x = jnp.transpose(x_nchw, (0, 2, 3, 1)).astype(jnp.float32)

    def conv(inp, w_oihw, b):
        return jax.lax.conv_general_dilated(
            inp, jnp.transpose(w_oihw, (2, 3, 1, 0)).astype(jnp.float32),
            window_strides=(1, 1), padding="SAME",
            dimension_numbers=("NHWC", "HWIO", "NHWC"),
        ) + b.reshape(1, 1, 1, -1)

    def bn(inp, g, be):
        m = jnp.mean(inp, axis=(0, 1, 2), keepdims=True)
        v = jnp.mean((inp - m) ** 2, axis=(0, 1, 2), keepdims=True)
        return (inp - m) * jax.lax.rsqrt(v + EPS) * g.reshape(1, 1, 1, -1) \
            + be.reshape(1, 1, 1, -1)

    identity = conv(x, w1, b1)
    out = jax.nn.relu(bn(identity, g1, be1))
    out = conv(out, w2, b2)
    out = bn(out, g2, be2) + identity
    out = jax.nn.relu(out)
    return jnp.transpose(out, (0, 3, 1, 2))


if __name__ == "__main__":
    # Small shapes consistent with the module: N=2, in_ch=4, out_ch=8, 16x16.
    N, Cin, Cout, H, W = 2, 4, 8, 16, 16

    key = jax.random.PRNGKey(0)
    kx, kw1, kb1, kw2, kb2 = jax.random.split(key, 5)

    x = jax.random.normal(kx, (N, Cin, H, W), dtype=jnp.float32)

    # Deterministic parameter init (PyTorch-like: random conv w/b, BN gamma=1 beta=0).
    fan1 = Cin * 9
    w1 = jax.random.uniform(kw1, (Cout, Cin, 3, 3), jnp.float32,
                            -1.0 / np.sqrt(fan1), 1.0 / np.sqrt(fan1))
    b1 = jax.random.uniform(kb1, (Cout,), jnp.float32,
                            -1.0 / np.sqrt(fan1), 1.0 / np.sqrt(fan1))
    fan2 = Cout * 9
    w2 = jax.random.uniform(kw2, (Cout, Cout, 3, 3), jnp.float32,
                            -1.0 / np.sqrt(fan2), 1.0 / np.sqrt(fan2))
    b2 = jax.random.uniform(kb2, (Cout,), jnp.float32,
                            -1.0 / np.sqrt(fan2), 1.0 / np.sqrt(fan2))
    g1 = jnp.ones((Cout,), jnp.float32)
    be1 = jnp.zeros((Cout,), jnp.float32)
    g2 = jnp.ones((Cout,), jnp.float32)
    be2 = jnp.zeros((Cout,), jnp.float32)

    out = resblock_forward(x, w1, b1, g1, be1, w2, b2, g2, be2)
    out = jax.block_until_ready(out)

    ref = _reference_forward(x, w1, b1, g1, be1, w2, b2, g2, be2)
    np.testing.assert_allclose(np.asarray(out), np.asarray(ref),
                               rtol=1e-4, atol=2e-4)

    print("KERNEL_OK")
</pallas_src>

<mosaic_0001>
module attributes {stable_mosaic.version = 11 : i64} {
  func.func @_resblock_kernel(%arg0: memref<4x686xf32, #tpu.memory_space<vmem>>, %arg1: memref<9x8x4xf32, #tpu.memory_space<vmem>>, %arg2: memref<8x1xf32, #tpu.memory_space<vmem>>, %arg3: memref<8x1xf32, #tpu.memory_space<vmem>>, %arg4: memref<8x1xf32, #tpu.memory_space<vmem>>, %arg5: memref<9x8x8xf32, #tpu.memory_space<vmem>>, %arg6: memref<8x1xf32, #tpu.memory_space<vmem>>, %arg7: memref<8x1xf32, #tpu.memory_space<vmem>>, %arg8: memref<8x1xf32, #tpu.memory_space<vmem>>, %arg9: memref<1x648xf32, #tpu.memory_space<vmem>>, %arg10: memref<8x648xf32, #tpu.memory_space<vmem>>, %arg11: memref<8x795xf32, #tpu.memory_space<vmem>>) attributes {dimension_semantics = [], scalar_prefetch = 0 : i64, scratch_operands = 1 : i64, tpu.core_type = #tpu.core_type<tc>} {
    %c0 = arith.constant 0 : index
    %c0_0 = arith.constant 0 : index
    %c0_1 = arith.constant 0 : index
    %0 = vector.load %arg1[%c0, %c0_0, %c0_1] : memref<9x8x4xf32, #tpu.memory_space<vmem>>, vector<1x8x4xf32>
    %1 = vector.shape_cast %0 : vector<1x8x4xf32> to vector<8x4xf32>
    %c0_2 = arith.constant 0 : index
    %c0_3 = arith.constant 0 : index
    %2 = vector.load %arg0[%c0_2, %c0_3] : memref<4x686xf32, #tpu.memory_space<vmem>>, vector<4x648xf32>
    %cst = arith.constant dense<0.000000e+00> : vector<8x648xf32>
    %3 = tpu.matmul %1, %2, %cst {dimension_numbers = #tpu.dot_dimension_numbers<[1], [0], [0], [1], [0, 0, 1, 1], [], []>} : vector<8x4xf32>, vector<4x648xf32>, vector<8x648xf32> -> vector<8x648xf32>
    %c1 = arith.constant 1 : index
    %c0_4 = arith.constant 0 : index
    %c0_5 = arith.constant 0 : index
    %4 = vector.load %arg1[%c1, %c0_4, %c0_5] : memref<9x8x4xf32, #tpu.memory_space<vmem>>, vector<1x8x4xf32>
    %5 = vector.shape_cast %4 : vector<1x8x4xf32> to vector<8x4xf32>
    %c0_6 = arith.constant 0 : index
    %c1_7 = arith.constant 1 : index
    %6 = vector.load %arg0[%c0_6, %c1_7] : memref<4x686xf32, #tpu.memory_space<vmem>>, vector<4x648xf32>
    %cst_8 = arith.constant dense<0.000000e+00> : vector<8x648xf32>
    %7 = tpu.matmul %5, %6, %cst_8 {dimension_numbers = #tpu.dot_dimension_numbers<[1], [0], [0], [1], [0, 0, 1, 1], [], []>} : vector<8x4xf32>, vector<4x648xf32>, vector<8x648xf32> -> vector<8x648xf32>
    %8 = arith.addf %3, %7 : vector<8x648xf32>
    %c2 = arith.constant 2 : index
    %c0_9 = arith.constant 0 : index
    %c0_10 = arith.constant 0 : index
    %9 = vector.load %arg1[%c2, %c0_9, %c0_10] : memref<9x8x4xf32, #tpu.memory_space<vmem>>, vector<1x8x4xf32>
    %10 = vector.shape_cast %9 : vector<1x8x4xf32> to vector<8x4xf32>
    %c0_11 = arith.constant 0 : index
    %c2_12 = arith.constant 2 : index
    %11 = vector.load %arg0[%c0_11, %c2_12] : memref<4x686xf32, #tpu.memory_space<vmem>>, vector<4x648xf32>
    %cst_13 = arith.constant dense<0.000000e+00> : vector<8x648xf32>
    %12 = tpu.matmul %10, %11, %cst_13 {dimension_numbers = #tpu.dot_dimension_numbers<[1], [0], [0], [1], [0, 0, 1, 1], [], []>} : vector<8x4xf32>, vector<4x648xf32>, vector<8x648xf32> -> vector<8x648xf32>
    %13 = arith.addf %8, %12 : vector<8x648xf32>
    %c3 = arith.constant 3 : index
    %c0_14 = arith.constant 0 : index
    %c0_15 = arith.constant 0 : index
    %14 = vector.load %arg1[%c3, %c0_14, %c0_15] : memref<9x8x4xf32, #tpu.memory_space<vmem>>, vector<1x8x4xf32>
    %15 = vector.shape_cast %14 : vector<1x8x4xf32> to vector<8x4xf32>
    %c0_16 = arith.constant 0 : index
    %c18 = arith.constant 18 : index
    %16 = vector.load %arg0[%c0_16, %c18] : memref<4x686xf32, #tpu.memory_space<vmem>>, vector<4x648xf32>
    %cst_17 = arith.constant dense<0.000000e+00> : vector<8x648xf32>
    %17 = tpu.matmul %15, %16, %cst_17 {dimension_numbers = #tpu.dot_dimension_numbers<[1], [0], [0], [1], [0, 0, 1, 1], [], []>} : vector<8x4xf32>, vector<4x648xf32>, vector<8x648xf32> -> vector<8x648xf32>
    %18 = arith.addf %13, %17 : vector<8x648xf32>
    %c4 = arith.constant 4 : index
    %c0_18 = arith.constant 0 : index
    %c0_19 = arith.constant 0 : index
    %19 = vector.load %arg1[%c4, %c0_18, %c0_19] : memref<9x8x4xf32, #tpu.memory_space<vmem>>, vector<1x8x4xf32>
    %20 = vector.shape_cast %19 : vector<1x8x4xf32> to vector<8x4xf32>
    %c0_20 = arith.constant 0 : index
    %c19 = arith.constant 19 : index
    %21 = vector.load %arg0[%c0_20, %c19] : memref<4x686xf32, #tpu.memory_space<vmem>>, vector<4x648xf32>
    %cst_21 = arith.constant dense<0.000000e+00> : vector<8x648xf32>
    %22 = tpu.matmul %20, %21, %cst_21 {dimension_numbers = #tpu.dot_dimension_numbers<[1], [0], [0], [1], [0, 0, 1, 1], [], []>} : vector<8x4xf32>, vector<4x648xf32>, vector<8x648xf32> -> vector<8x648xf32>
    %23 = arith.addf %18, %22 : vector<8x648xf32>
    %c5 = arith.constant 5 : index
    %c0_22 = arith.constant 0 : index
    %c0_23 = arith.constant 0 : index
    %24 = vector.load %arg1[%c5, %c0_22, %c0_23] : memref<9x8x4xf32, #tpu.memory_space<vmem>>, vector<1x8x4xf32>
    %25 = vector.shape_cast %24 : vector<1x8x4xf32> to vector<8x4xf32>
    %c0_24 = arith.constant 0 : index
    %c20 = arith.constant 20 : index
    %26 = vector.load %arg0[%c0_24, %c20] : memref<4x686xf32, #tpu.memory_space<vmem>>, vector<4x648xf32>
    %cst_25 = arith.constant dense<0.000000e+00> : vector<8x648xf32>
    %27 = tpu.matmul %25, %26, %cst_25 {dimension_numbers = #tpu.dot_dimension_numbers<[1], [0], [0], [1], [0, 0, 1, 1], [], []>} : vector<8x4xf32>, vector<4x648xf32>, vector<8x648xf32> -> vector<8x648xf32>
    %28 = arith.addf %23, %27 : vector<8x648xf32>
    %c6 = arith.constant 6 : index
    %c0_26 = arith.constant 0 : index
    %c0_27 = arith.constant 0 : index
    %29 = vector.load %arg1[%c6, %c0_26, %c0_27] : memref<9x8x4xf32, #tpu.memory_space<vmem>>, vector<1x8x4xf32>
    %30 = vector.shape_cast %29 : vector<1x8x4xf32> to vector<8x4xf32>
    %c0_28 = arith.constant 0 : index
    %c36 = arith.constant 36 : index
    %31 = vector.load %arg0[%c0_28, %c36] : memref<4x686xf32, #tpu.memory_space<vmem>>, vector<4x648xf32>
    %cst_29 = arith.constant dense<0.000000e+00> : vector<8x648xf32>
    %32 = tpu.matmul %30, %31, %cst_29 {dimension_numbers = #tpu.dot_dimension_numbers<[1], [0], [0], [1], [0, 0, 1, 1], [], []>} : vector<8x4xf32>, vector<4x648xf32>, vector<8x648xf32> -> vector<8x648xf32>
    %33 = arith.addf %28, %32 : vector<8x648xf32>
    %c7 = arith.constant 7 : index
    %c0_30 = arith.constant 0 : index
    %c0_31 = arith.constant 0 : index
    %34 = vector.load %arg1[%c7, %c0_30, %c0_31] : memref<9x8x4xf32, #tpu.memory_space<vmem>>, vector<1x8x4xf32>
    %35 = vector.shape_cast %34 : vector<1x8x4xf32> to vector<8x4xf32>
    %c0_32 = arith.constant 0 : index
    %c37 = arith.constant 37 : index
    %36 = vector.load %arg0[%c0_32, %c37] : memref<4x686xf32, #tpu.memory_space<vmem>>, vector<4x648xf32>
    %cst_33 = arith.constant dense<0.000000e+00> : vector<8x648xf32>
    %37 = tpu.matmul %35, %36, %cst_33 {dimension_numbers = #tpu.dot_dimension_numbers<[1], [0], [0], [1], [0, 0, 1, 1], [], []>} : vector<8x4xf32>, vector<4x648xf32>, vector<8x648xf32> -> vector<8x648xf32>
    %38 = arith.addf %33, %37 : vector<8x648xf32>
    %c8 = arith.constant 8 : index
    %c0_34 = arith.constant 0 : index
    %c0_35 = arith.constant 0 : index
    %39 = vector.load %arg1[%c8, %c0_34, %c0_35] : memref<9x8x4xf32, #tpu.memory_space<vmem>>, vector<1x8x4xf32>
    %40 = vector.shape_cast %39 : vector<1x8x4xf32> to vector<8x4xf32>
    %c0_36 = arith.constant 0 : index
    %c38 = arith.constant 38 : index
    %41 = vector.load %arg0[%c0_36, %c38] : memref<4x686xf32, #tpu.memory_space<vmem>>, vector<4x648xf32>
    %cst_37 = arith.constant dense<0.000000e+00> : vector<8x648xf32>
    %42 = tpu.matmul %40, %41, %cst_37 {dimension_numbers = #tpu.dot_dimension_numbers<[1], [0], [0], [1], [0, 0, 1, 1], [], []>} : vector<8x4xf32>, vector<4x648xf32>, vector<8x648xf32> -> vector<8x648xf32>
    %43 = arith.addf %38, %42 : vector<8x648xf32>
    %c0_38 = arith.constant 0 : index
    %c0_39 = arith.constant 0 : index
    %44 = vector.load %arg2[%c0_38, %c0_39] : memref<8x1xf32, #tpu.memory_space<vmem>>, vector<8x1xf32>
    %45 = vector.broadcast %44 : vector<8x1xf32> to vector<8x648xf32>
    %46 = arith.addf %43, %45 : vector<8x648xf32>
    %c0_40 = arith.constant 0 : index
    %c0_41 = arith.constant 0 : index
    %47 = vector.load %arg9[%c0_40, %c0_41] : memref<1x648xf32, #tpu.memory_space<vmem>>, vector<1x648xf32>
    %48 = vector.broadcast %47 : vector<1x648xf32> to vector<8x648xf32>
    %49 = arith.mulf %46, %48 : vector<8x648xf32>
    %cst_42 = arith.constant dense<0.000000e+00> : vector<8xf32>
    %50 = vector.multi_reduction <add>, %49, %cst_42 [1] : vector<8x648xf32> to vector<8xf32>
    %51 = vector.shape_cast %50 : vector<8xf32> to vector<8x1xf32>
    %52 = arith.mulf %49, %46 : vector<8x648xf32>
    %cst_43 = arith.constant dense<0.000000e+00> : vector<8xf32>
    %53 = vector.multi_reduction <add>, %52, %cst_43 [1] : vector<8x648xf32> to vector<8xf32>
    %54 = vector.shape_cast %53 : vector<8xf32> to vector<8x1xf32>
    %cst_44 = arith.constant 0.001953125 : f32
    %55 = vector.broadcast %cst_44 : f32 to vector<8x1xf32>
    %56 = arith.mulf %51, %55 : vector<8x1xf32>
    %cst_45 = arith.constant 0.001953125 : f32
    %57 = vector.broadcast %cst_45 : f32 to vector<8x1xf32>
    %58 = arith.mulf %54, %57 : vector<8x1xf32>
    %59 = arith.mulf %56, %56 : vector<8x1xf32>
    %60 = arith.subf %58, %59 : vector<8x1xf32>
    %c0_46 = arith.constant 0 : index
    %c0_47 = arith.constant 0 : index
    %61 = vector.load %arg3[%c0_46, %c0_47] : memref<8x1xf32, #tpu.memory_space<vmem>>, vector<8x1xf32>
    %cst_48 = arith.constant 9.99999974E-6 : f32
    %62 = vector.broadcast %cst_48 : f32 to vector<8x1xf32>
    %63 = arith.addf %60, %62 : vector<8x1xf32>
    %64 = math.rsqrt %63 : vector<8x1xf32>
    %65 = arith.mulf %61, %64 : vector<8x1xf32>
    %c0_49 = arith.constant 0 : index
    %c0_50 = arith.constant 0 : index
    %66 = vector.load %arg4[%c0_49, %c0_50] : memref<8x1xf32, #tpu.memory_space<vmem>>, vector<8x1xf32>
    %67 = arith.mulf %56, %65 : vector<8x1xf32>
    %68 = arith.subf %66, %67 : vector<8x1xf32>
    %69 = vector.broadcast %65 : vector<8x1xf32> to vector<8x648xf32>
    %70 = arith.mulf %46, %69 : vector<8x648xf32>
    %71 = vector.broadcast %68 : vector<8x1xf32> to vector<8x648xf32>
    %72 = arith.addf %70, %71 : vector<8x648xf32>
    %cst_51 = arith.constant 0.000000e+00 : f32
    %73 = vector.broadcast %cst_51 : f32 to vector<8x648xf32>
    %74 = arith.maximumf %72, %73 : vector<8x648xf32>
    %75 = vector.broadcast %47 : vector<1x648xf32> to vector<8x648xf32>
    %76 = arith.mulf %74, %75 : vector<8x648xf32>
    %cst_52 = arith.constant 0.000000e+00 : f32
    %77 = vector.broadcast %cst_52 : f32 to vector<8x128xf32>
    %c0_53 = arith.constant 0 : index
    %c0_54 = arith.constant 0 : index
    %78 = vector.load %arg11[%c0_53, %c0_54] : memref<8x795xf32, #tpu.memory_space<vmem>>, vector<8x128xf32>
    tpu.vector_store %arg11[%c0_53, %c0_54], %77 {strides = array<i32>} : memref<8x795xf32, #tpu.memory_space<vmem>>, vector<8x128xf32>,
    %c0_55 = arith.constant 0 : index
    %c128 = arith.constant 128 : index
    %79 = vector.load %arg11[%c0_55, %c128] : memref<8x795xf32, #tpu.memory_space<vmem>>, vector<8x648xf32>
    tpu.vector_store %arg11[%c0_55, %c128], %76 {strides = array<i32>} : memref<8x795xf32, #tpu.memory_space<vmem>>, vector<8x648xf32>,
    %cst_56 = arith.constant 0.000000e+00 : f32
    %80 = vector.broadcast %cst_56 : f32 to vector<8x19xf32>
    %c0_57 = arith.constant 0 : index
    %c776 = arith.constant 776 : index
    %81 = vector.load %arg11[%c0_57, %c776] : memref<8x795xf32, #tpu.memory_space<vmem>>, vector<8x19xf32>
    tpu.vector_store %arg11[%c0_57, %c776], %80 {strides = array<i32>} : memref<8x795xf32, #tpu.memory_space<vmem>>, vector<8x19xf32>,
    %c0_58 = arith.constant 0 : index
    %c0_59 = arith.constant 0 : index
    %c0_60 = arith.constant 0 : index
    %82 = vector.load %arg5[%c0_58, %c0_59, %c0_60] : memref<9x8x8xf32, #tpu.memory_space<vmem>>, vector<1x8x8xf32>
    %83 = vector.shape_cast %82 : vector<1x8x8xf32> to vector<8x8xf32>
    %c0_61 = arith.constant 0 : index
    %c109 = arith.constant 109 : index
    %84 = vector.load %arg11[%c0_61, %c109] : memref<8x795xf32, #tpu.memory_space<vmem>>, vector<8x648xf32>
    %cst_62 = arith.constant dense<0.000000e+00> : vector<8x648xf32>
    %85 = tpu.matmul %83, %84, %cst_62 {dimension_numbers = #tpu.dot_dimension_numbers<[1], [0], [0], [1], [0, 0, 1, 1], [], []>} : vector<8x8xf32>, vector<8x648xf32>, vector<8x648xf32> -> vector<8x648xf32>
    %c1_63 = arith.constant 1 : index
    %c0_64 = arith.constant 0 : index
    %c0_65 = arith.constant 0 : index
    %86 = vector.load %arg5[%c1_63, %c0_64, %c0_65] : memref<9x8x8xf32, #tpu.memory_space<vmem>>, vector<1x8x8xf32>
    %87 = vector.shape_cast %86 : vector<1x8x8xf32> to vector<8x8xf32>
    %c0_66 = arith.constant 0 : index
    %c110 = arith.constant 110 : index
    %88 = vector.load %arg11[%c0_66, %c110] : memref<8x795xf32, #tpu.memory_space<vmem>>, vector<8x648xf32>
    %cst_67 = arith.constant dense<0.000000e+00> : vector<8x648xf32>
    %89 = tpu.matmul %87, %88, %cst_67 {dimension_numbers = #tpu.dot_dimension_numbers<[1], [0], [0], [1], [0, 0, 1, 1], [], []>} : vector<8x8xf32>, vector<8x648xf32>, vector<8x648xf32> -> vector<8x648xf32>
    %90 = arith.addf %85, %89 : vector<8x648xf32>
    %c2_68 = arith.constant 2 : index
    %c0_69 = arith.constant 0 : index
    %c0_70 = arith.constant 0 : index
    %91 = vector.load %arg5[%c2_68, %c0_69, %c0_70] : memref<9x8x8xf32, #tpu.memory_space<vmem>>, vector<1x8x8xf32>
    %92 = vector.shape_cast %91 : vector<1x8x8xf32> to vector<8x8xf32>
    %c0_71 = arith.constant 0 : index
    %c111 = arith.constant 111 : index
    %93 = vector.load %arg11[%c0_71, %c111] : memref<8x795xf32, #tpu.memory_space<vmem>>, vector<8x648xf32>
    %cst_72 = arith.constant dense<0.000000e+00> : vector<8x648xf32>
    %94 = tpu.matmul %92, %93, %cst_72 {dimension_numbers = #tpu.dot_dimension_numbers<[1], [0], [0], [1], [0, 0, 1, 1], [], []>} : vector<8x8xf32>, vector<8x648xf32>, vector<8x648xf32> -> vector<8x648xf32>
    %95 = arith.addf %90, %94 : vector<8x648xf32>
    %c3_73 = arith.constant 3 : index
    %c0_74 = arith.constant 0 : index
    %c0_75 = arith.constant 0 : index
    %96 = vector.load %arg5[%c3_73, %c0_74, %c0_75] : memref<9x8x8xf32, #tpu.memory_space<vmem>>, vector<1x8x8xf32>
    %97 = vector.shape_cast %96 : vector<1x8x8xf32> to vector<8x8xf32>
    %c0_76 = arith.constant 0 : index
    %c127 = arith.constant 127 : index
    %98 = vector.load %arg11[%c0_76, %c127] : memref<8x795xf32, #tpu.memory_space<vmem>>, vector<8x648xf32>
    %cst_77 = arith.constant dense<0.000000e+00> : vector<8x648xf32>
    %99 = tpu.matmul %97, %98, %cst_77 {dimension_numbers = #tpu.dot_dimension_numbers<[1], [0], [0], [1], [0, 0, 1, 1], [], []>} : vector<8x8xf32>, vector<8x648xf32>, vector<8x648xf32> -> vector<8x648xf32>
    %100 = arith.addf %95, %99 : vector<8x648xf32>
    %c4_78 = arith.constant 4 : index
    %c0_79 = arith.constant 0 : index
    %c0_80 = arith.constant 0 : index
    %101 = vector.load %arg5[%c4_78, %c0_79, %c0_80] : memref<9x8x8xf32, #tpu.memory_space<vmem>>, vector<1x8x8xf32>
    %102 = vector.shape_cast %101 : vector<1x8x8xf32> to vector<8x8xf32>
    %c0_81 = arith.constant 0 : index
    %c128_82 = arith.constant 128 : index
    %103 = vector.load %arg11[%c0_81, %c128_82] : memref<8x795xf32, #tpu.memory_space<vmem>>, vector<8x648xf32>
    %cst_83 = arith.constant dense<0.000000e+00> : vector<8x648xf32>
    %104 = tpu.matmul %102, %103, %cst_83 {dimension_numbers = #tpu.dot_dimension_numbers<[1], [0], [0], [1], [0, 0, 1, 1], [], []>} : vector<8x8xf32>, vector<8x648xf32>, vector<8x648xf32> -> vector<8x648xf32>
    %105 = arith.addf %100, %104 : vector<8x648xf32>
    %c5_84 = arith.constant 5 : index
    %c0_85 = arith.constant 0 : index
    %c0_86 = arith.constant 0 : index
    %106 = vector.load %arg5[%c5_84, %c0_85, %c0_86] : memref<9x8x8xf32, #tpu.memory_space<vmem>>, vector<1x8x8xf32>
    %107 = vector.shape_cast %106 : vector<1x8x8xf32> to vector<8x8xf32>
    %c0_87 = arith.constant 0 : index
    %c129 = arith.constant 129 : index
    %108 = vector.load %arg11[%c0_87, %c129] : memref<8x795xf32, #tpu.memory_space<vmem>>, vector<8x648xf32>
    %cst_88 = arith.constant dense<0.000000e+00> : vector<8x648xf32>
    %109 = tpu.matmul %107, %108, %cst_88 {dimension_numbers = #tpu.dot_dimension_numbers<[1], [0], [0], [1], [0, 0, 1, 1], [], []>} : vector<8x8xf32>, vector<8x648xf32>, vector<8x648xf32> -> vector<8x648xf32>
    %110 = arith.addf %105, %109 : vector<8x648xf32>
    %c6_89 = arith.constant 6 : index
    %c0_90 = arith.constant 0 : index
    %c0_91 = arith.constant 0 : index
    %111 = vector.load %arg5[%c6_89, %c0_90, %c0_91] : memref<9x8x8xf32, #tpu.memory_space<vmem>>, vector<1x8x8xf32>
    %112 = vector.shape_cast %111 : vector<1x8x8xf32> to vector<8x8xf32>
    %c0_92 = arith.constant 0 : index
    %c145 = arith.constant 145 : index
    %113 = vector.load %arg11[%c0_92, %c145] : memref<8x795xf32, #tpu.memory_space<vmem>>, vector<8x648xf32>
    %cst_93 = arith.constant dense<0.000000e+00> : vector<8x648xf32>
    %114 = tpu.matmul %112, %113, %cst_93 {dimension_numbers = #tpu.dot_dimension_numbers<[1], [0], [0], [1], [0, 0, 1, 1], [], []>} : vector<8x8xf32>, vector<8x648xf32>, vector<8x648xf32> -> vector<8x648xf32>
    %115 = arith.addf %110, %114 : vector<8x648xf32>
    %c7_94 = arith.constant 7 : index
    %c0_95 = arith.constant 0 : index
    %c0_96 = arith.constant 0 : index
    %116 = vector.load %arg5[%c7_94, %c0_95, %c0_96] : memref<9x8x8xf32, #tpu.memory_space<vmem>>, vector<1x8x8xf32>
    %117 = vector.shape_cast %116 : vector<1x8x8xf32> to vector<8x8xf32>
    %c0_97 = arith.constant 0 : index
    %c146 = arith.constant 146 : index
    %118 = vector.load %arg11[%c0_97, %c146] : memref<8x795xf32, #tpu.memory_space<vmem>>, vector<8x648xf32>
    %cst_98 = arith.constant dense<0.000000e+00> : vector<8x648xf32>
    %119 = tpu.matmul %117, %118, %cst_98 {dimension_numbers = #tpu.dot_dimension_numbers<[1], [0], [0], [1], [0, 0, 1, 1], [], []>} : vector<8x8xf32>, vector<8x648xf32>, vector<8x648xf32> -> vector<8x648xf32>
    %120 = arith.addf %115, %119 : vector<8x648xf32>
    %c8_99 = arith.constant 8 : index
    %c0_100 = arith.constant 0 : index
    %c0_101 = arith.constant 0 : index
    %121 = vector.load %arg5[%c8_99, %c0_100, %c0_101] : memref<9x8x8xf32, #tpu.memory_space<vmem>>, vector<1x8x8xf32>
    %122 = vector.shape_cast %121 : vector<1x8x8xf32> to vector<8x8xf32>
    %c0_102 = arith.constant 0 : index
    %c147 = arith.constant 147 : index
    %123 = vector.load %arg11[%c0_102, %c147] : memref<8x795xf32, #tpu.memory_space<vmem>>, vector<8x648xf32>
    %cst_103 = arith.constant dense<0.000000e+00> : vector<8x648xf32>
    %124 = tpu.matmul %122, %123, %cst_103 {dimension_numbers = #tpu.dot_dimension_numbers<[1], [0], [0], [1], [0, 0, 1, 1], [], []>} : vector<8x8xf32>, vector<8x648xf32>, vector<8x648xf32> -> vector<8x648xf32>
    %125 = arith.addf %120, %124 : vector<8x648xf32>
    %c0_104 = arith.constant 0 : index
    %c0_105 = arith.constant 0 : index
    %126 = vector.load %arg6[%c0_104, %c0_105] : memref<8x1xf32, #tpu.memory_space<vmem>>, vector<8x1xf32>
    %127 = vector.broadcast %126 : vector<8x1xf32> to vector<8x648xf32>
    %128 = arith.addf %125, %127 : vector<8x648xf32>
    %129 = vector.broadcast %47 : vector<1x648xf32> to vector<8x648xf32>
    %130 = arith.mulf %128, %129 : vector<8x648xf32>
    %cst_106 = arith.constant dense<0.000000e+00> : vector<8xf32>
    %131 = vector.multi_reduction <add>, %130, %cst_106 [1] : vector<8x648xf32> to vector<8xf32>
    %132 = vector.shape_cast %131 : vector<8xf32> to vector<8x1xf32>
    %133 = arith.mulf %130, %128 : vector<8x648xf32>
    %cst_107 = arith.constant dense<0.000000e+00> : vector<8xf32>
    %134 = vector.multi_reduction <add>, %133, %cst_107 [1] : vector<8x648xf32> to vector<8xf32>
    %135 = vector.shape_cast %134 : vector<8xf32> to vector<8x1xf32>
    %cst_108 = arith.constant 0.001953125 : f32
    %136 = vector.broadcast %cst_108 : f32 to vector<8x1xf32>
    %137 = arith.mulf %132, %136 : vector<8x1xf32>
    %cst_109 = arith.constant 0.001953125 : f32
    %138 = vector.broadcast %cst_109 : f32 to vector<8x1xf32>
    %139 = arith.mulf %135, %138 : vector<8x1xf32>
    %140 = arith.mulf %137, %137 : vector<8x1xf32>
    %141 = arith.subf %139, %140 : vector<8x1xf32>
    %c0_110 = arith.constant 0 : index
    %c0_111 = arith.constant 0 : index
    %142 = vector.load %arg7[%c0_110, %c0_111] : memref<8x1xf32, #tpu.memory_space<vmem>>, vector<8x1xf32>
    %cst_112 = arith.constant 9.99999974E-6 : f32
    %143 = vector.broadcast %cst_112 : f32 to vector<8x1xf32>
    %144 = arith.addf %141, %143 : vector<8x1xf32>
    %145 = math.rsqrt %144 : vector<8x1xf32>
    %146 = arith.mulf %142, %145 : vector<8x1xf32>
    %c0_113 = arith.constant 0 : index
    %c0_114 = arith.constant 0 : index
    %147 = vector.load %arg8[%c0_113, %c0_114] : memref<8x1xf32, #tpu.memory_space<vmem>>, vector<8x1xf32>
    %148 = arith.mulf %137, %146 : vector<8x1xf32>
    %149 = arith.subf %147, %148 : vector<8x1xf32>
    %150 = vector.broadcast %146 : vector<8x1xf32> to vector<8x648xf32>
    %151 = arith.mulf %128, %150 : vector<8x648xf32>
    %152 = vector.broadcast %149 : vector<8x1xf32> to vector<8x648xf32>
    %153 = arith.addf %151, %152 : vector<8x648xf32>
    %154 = arith.addf %153, %46 : vector<8x648xf32>
    %cst_115 = arith.constant 0.000000e+00 : f32
    %155 = vector.broadcast %cst_115 : f32 to vector<8x648xf32>
    %156 = arith.maximumf %154, %155 : vector<8x648xf32>
    %c0_116 = arith.constant 0 : index
    %c0_117 = arith.constant 0 : index
    %157 = vector.load %arg10[%c0_116, %c0_117] : memref<8x648xf32, #tpu.memory_space<vmem>>, vector<8x648xf32>
    tpu.vector_store %arg10[%c0_116, %c0_117], %156 {strides = array<i32>} : memref<8x648xf32, #tpu.memory_space<vmem>>, vector<8x648xf32>,
    return
  }
}

</mosaic_0001>

<bundles_post_ra>
// kernel: resblock_forward.1
= control target key start
LH: loop header
LB: loop body
LE: loop exit
PB: predicated region body
PF: predicated region fallthrough
CT: control target
= control target key end

     0   :  { %v5052_v2 = vmov 0.0   ;;  %s5053_s17 = smov 127   ;;  %s5054_s20 = smov 126   ;;  %v5061_v7 = vmov 0   ;;  %vm59_vm0 = vcmask 1039360   ;;  %vm69_vm1 = vcmask 1043456   ;;  %s5724_s0 = inlined_call_operand.vmem [shape: f32[4,686], index: 0, kind: input, shape index: {}]   ;;  %s5725_s2 = inlined_call_operand.vmem [shape: f32[8,1], index: 2, kind: input, shape index: {}]   ;;  %s5726_s1 = inlined_call_operand.vmem [shape: f32[9,8,4], index: 1, kind: input, shape index: {}]   ;;  %s5727_s9 = inlined_call_operand.vmem [shape: f32[1,648], index: 9, kind: input, shape index: {}]   ;;  %s5728_s3 = inlined_call_operand.vmem [shape: f32[8,1], index: 3, kind: input, shape index: {}]   ;;  %s5729_s4 = inlined_call_operand.vmem [shape: f32[8,1], index: 4, kind: input, shape index: {}]   ;;  %s5730_s6 = inlined_call_operand.vmem [shape: f32[8,1], index: 6, kind: input, shape index: {}]   ;;  %s5731_s5 = inlined_call_operand.vmem [shape: f32[9,8,8], index: 5, kind: input, shape index: {}]   ;;  %s5732_s7 = inlined_call_operand.vmem [shape: f32[8,1], index: 7, kind: input, shape index: {}]   ;;  %s5733_s8 = inlined_call_operand.vmem [shape: f32[8,1], index: 8, kind: input, shape index: {}]   ;;  %s5734_s10 = inlined_call_operand.vmem [shape: f32[8,648], index: 10, kind: output, shape index: {}]  }
   0x1   :  { %v5125_v0 = vld [vmem:[%s5724_s0 + $0x8] sm:$0xff]  ;;  %v5130_v1 = vld [vmem:[%s5724_s0] sm:$0xff]  ;;  %146 = vmatprep.mubr.f32.mxu0 %v5052_v2  ;;  %2482 = vst [vmem:[#allocation2] sm:$0xff] %v5052_v2  ;;  %2597 = vmatprep.mubr.f32.mxu1 %v5052_v2  ;;  %v5150_v5 = vld [vmem:[%s5724_s0 + $0x10] sm:$0xff]  ;;  %s5055_s0 = smov 110   ;;  %s5056_s21 = smov 109  }
   0x2   :  { %51 = vrot.lane.b32.xlu0 %v5125_v0, %s5053_s17  ;;  %47 = vrot.lane.b32.xlu1 %v5130_v1, %s5053_s17  ;;  %v5141_v3 = vcombine.high %v5125_v0, %v5125_v0  ;;  %v5145_v4 = vcombine.high %v5130_v1, %v5130_v1  ;;  %v5158_v6 = vcombine.high %v5150_v5, %v5150_v5  ;;  %s5057_s22 = smov 108   ;;  %s5058_s23 = smov 92   ;;  %v2364_v8 = vld [vmem:[%s5725_s2] sm:$0xff]  ;;  %v4807_v15 = vld [vmem:[%s5726_s1 + $0x8] sm:$0xff]  ;;  %vm65_vm2 = vcmask 31744  }
   0x3   :  { %s5059_s24 = smov 91   ;;  %s5060_s25 = smov 90   ;;  %5042 = vset.pattern.permute.xlu0 %v5061_v7  ;;  %5043 = vset.pattern.permute.xlu1 %v5061_v7  ;;  %v35_v25 = vld [vmem:[%s5726_s1] sm:$0xff]  ;;  %vm546_vm3 = vcmask 1031168   ;;  %v4826_v35 = vld [vmem:[%s5726_s1 + $0x10] sm:$0xff]  ;;  %vm809_vm4 = vcmask 900096  }
   0x4   :  { %v4836_v47 = vld [vmem:[%s5726_s1 + $0x18] sm:$0xff]  ;;  %vm1072_vm5 = vcmask 891904   ;;  %v4846_v59 = vld [vmem:[%s5726_s1 + $0x20] sm:$0xff]  ;;  %vm1335_vm6 = vcmask 883712   ;;  %vm1598_vm7 = vcmask 752640   ;;  %vm1861_vm8 = vcmask 744448  }
   0x5   :  { %vm2124_vm9 = vcmask 736256   ;;  %vm2418_vm10 = vcmask 64512   ;;  %s5062_s30 = smov 18   ;;  %vm2489_vm11 = vcmask 220224   ;;  %s5065_s11 = smov 1   ;;  %vm2518_vm12 = vcmask 146432  }
   0x6   :  { %53 = vrot.lane.b32.xlu1 %v5141_v3, %s5053_s17  ;;  %49 = vrot.lane.b32.xlu0 %v5145_v4, %s5053_s17  ;;  %s5066_s12 = smov 111   ;;  %vm2758_vm13 = vcmask 154624   ;;  %vm3000_vm14 = vcmask 138240   ;;  %vm3264_vm15 = vcmask 7168  }
   0xa   :  { %57 = vrot.lane.b32.xlu1 %v5158_v6, %s5053_s17  ;;  %55 = vrot.lane.b32.xlu0 %v5150_v5, %s5053_s17 }
   0xe   :  { %536 = vrot.lane.b32.xlu0 %v5145_v4, %s5054_s20  ;;  %538 = vrot.lane.b32.xlu1 %v5125_v0, %s5054_s20 }
  0x12   :  { %534 = vrot.lane.b32.xlu0 %v5130_v1, %s5054_s20  ;;  %540 = vrot.lane.b32.xlu1 %v5141_v3, %s5054_s20 }
  0x16   :  { %542 = vrot.lane.b32.xlu0 %v5150_v5, %s5054_s20  ;;  %544 = vrot.lane.b32.xlu1 %v5158_v6, %s5054_s20 }
  0x1a   :  { %799 = vrot.lane.b32.xlu0 %v5145_v4, %s5055_s0  ;;  %801 = vrot.lane.b32.xlu1 %v5125_v0, %s5055_s0 }
  0x1e   :  { %797 = vrot.lane.b32.xlu0 %v5130_v1, %s5055_s0  ;;  %803 = vrot.lane.b32.xlu1 %v5141_v3, %s5055_s0 }
  0x22   :  { %805 = vrot.lane.b32.xlu0 %v5150_v5, %s5055_s0  ;;  %807 = vrot.lane.b32.xlu1 %v5158_v6, %s5055_s0 }
  0x26   :  { %1062 = vrot.lane.b32.xlu0 %v5145_v4, %s5056_s21  ;;  %1064 = vrot.lane.b32.xlu1 %v5125_v0, %s5056_s21 }
  0x2a   :  { %1060 = vrot.lane.b32.xlu0 %v5130_v1, %s5056_s21  ;;  %1066 = vrot.lane.b32.xlu1 %v5141_v3, %s5056_s21 }
  0x2e   :  { %1068 = vrot.lane.b32.xlu0 %v5150_v5, %s5056_s21  ;;  %1070 = vrot.lane.b32.xlu1 %v5158_v6, %s5056_s21 }
  0x32   :  { %1325 = vrot.lane.b32.xlu0 %v5145_v4, %s5057_s22  ;;  %1327 = vrot.lane.b32.xlu1 %v5125_v0, %s5057_s22 }
  0x36   :  { %1323 = vrot.lane.b32.xlu0 %v5130_v1, %s5057_s22  ;;  %1329 = vrot.lane.b32.xlu1 %v5141_v3, %s5057_s22 }
  0x3a   :  { %1331 = vrot.lane.b32.xlu0 %v5150_v5, %s5057_s22  ;;  %1333 = vrot.lane.b32.xlu1 %v5158_v6, %s5057_s22 }
  0x3e   :  { %1588 = vrot.lane.b32.xlu0 %v5145_v4, %s5058_s23  ;;  %1590 = vrot.lane.b32.xlu1 %v5125_v0, %s5058_s23 }
  0x42   :  { %1586 = vrot.lane.b32.xlu0 %v5130_v1, %s5058_s23  ;;  %1592 = vrot.lane.b32.xlu1 %v5141_v3, %s5058_s23 }
  0x46   :  { %1594 = vrot.lane.b32.xlu0 %v5150_v5, %s5058_s23  ;;  %1596 = vrot.lane.b32.xlu1 %v5158_v6, %s5058_s23 }
  0x4a   :  { %1851 = vrot.lane.b32.xlu0 %v5145_v4, %s5059_s24  ;;  %1853 = vrot.lane.b32.xlu1 %v5125_v0, %s5059_s24 }
  0x4e   :  { %1849 = vrot.lane.b32.xlu0 %v5130_v1, %s5059_s24  ;;  %1855 = vrot.lane.b32.xlu1 %v5141_v3, %s5059_s24 }
  0x52   :  { %1857 = vrot.lane.b32.xlu0 %v5150_v5, %s5059_s24  ;;  %1859 = vrot.lane.b32.xlu1 %v5158_v6, %s5059_s24 }
  0x56   :  { %2114 = vrot.lane.b32.xlu0 %v5145_v4, %s5060_s25  ;;  %2116 = vrot.lane.b32.xlu1 %v5125_v0, %s5060_s25 }
  0x5a   :  { %2112 = vrot.lane.b32.xlu0 %v5130_v1, %s5060_s25  ;;  %2118 = vrot.lane.b32.xlu1 %v5141_v3, %s5060_s25 }
  0x5e   :  { %2120 = vrot.lane.b32.xlu0 %v5150_v5, %s5060_s25  ;;  %2122 = vrot.lane.b32.xlu1 %v5158_v6, %s5060_s25 }
  0x62   :  { %2367 = vperm.xlu0 %5042, %v2364_v8   ;;  %v4856_v8 = vld [vmem:[%s5726_s1 + $0x28] sm:$0xff] }
  0x74   :  { %v52_v9 = vpop.permute.xlu0 %51  ;;  %v48_v10 = vpop.permute.xlu1 %47 }
  0x78   :  { %v54_v11 = vpop.permute.xlu1 %53  ;;  %v50_v12 = vpop.permute.xlu0 %49 }
  0x79   :  { %v61_v13 = vsel %vm59_vm0, %v50_v12, %v52_v9  ;;  %v60_v14 = vsel %vm59_vm0, %v48_v10, %v50_v12  ;;  %v62_v19 = vsel %vm59_vm0, %v52_v9, %v54_v11 }
  0x7a   :  { %4808 = vmatprep.subr.msk.mxu0 %vm69_vm1, %v61_v13 }
  0x7b   :  { %4809 = vmatpush1.msk.msra.mxu0 %vm69_vm1, %v60_v14 }
  0x7c   :  { %v58_v16 = vpop.permute.xlu1 %57  ;;  %4810 = vmatmul.mubr.msk.f32.vlgmr.msra.gmra.mrb[0].mxu0 %vm65_vm2, %v4807_v15  ;;  %v56_v17 = vpop.permute.xlu0 %55 }
  0x7d   :  { %v63_v18 = vsel %vm59_vm0, %v54_v11, %v56_v17  ;;  %217 = vmatprep.mubr.f32.mxu0 %v5052_v2  ;;  %v64_v20 = vsel %vm59_vm0, %v56_v17, %v58_v16 }
  0x7e   :  { %4811 = vmatprep.subr.msk.mxu0 %vm69_vm1, %v63_v18 }
  0x7f   :  { %4812 = vmatpush1.msk.msra.mxu0 %vm69_vm1, %v62_v19  ;;  %v4866_v19 = vld [vmem:[%s5726_s1 + $0x30] sm:$0xff] }
  0x80   :  { %4813 = vmatmul.mubr.msk.f32.vlgmr.msra.gmra.mrb[2].mxu0 %vm65_vm2, %v4807_v15  ;;  %4814 = vmatprep.subr.msk.mxu0 %vm69_vm1, %v58_v16  ;;  %v537_v21 = vpop.permute.xlu0 %536  ;;  %v539_v22 = vpop.permute.xlu1 %538 }
  0x81   :  { %4815 = vmatpush1.msk.msra.mxu0 %vm69_vm1, %v64_v20  ;;  %288 = vmatprep.mubr.f32.mxu0 %v5052_v2  ;;  %v548_v28 = vsel %vm546_vm3, %v537_v21, %v539_v22 }
  0x82   :  { %4817 = vmatprep.subr.msk.mxu0 %vm69_vm1, %v5145_v4 }
  0x84   :  { %4816 = vmatmul.mubr.msk.f32.vlgmr.msra.gmra.mrb[4].mxu0 %vm65_vm2, %v4807_v15  ;;  %v535_v23 = vpop.permute.xlu0 %534  ;;  %v541_v24 = vpop.permute.xlu1 %540 }
  0x85   :  { %4818 = vmatpush1.msk.msra.mxu0 %vm69_vm1, %v5130_v1  ;;  %374 = vmatprep.mubr.f32.mxu0 %v5052_v2  ;;  %v547_v32 = vsel %vm546_vm3, %v535_v23, %v537_v21  ;;  %v549_v36 = vsel %vm546_vm3, %v539_v22, %v541_v24 }
  0x86   :  { %4820 = vmatprep.subr.msk.mxu0 %vm69_vm1, %v5141_v3 }
  0x88   :  { %4819 = vmatmul.mubr.msk.f32.vlgmr.msra.gmra.mrb[0].mxu0 %vm65_vm2, %v35_v25  ;;  %v543_v26 = vpop.permute.xlu0 %542  ;;  %v545_v27 = vpop.permute.xlu1 %544 }
  0x89   :  { %4821 = vmatpush1.msk.msra.mxu0 %vm69_vm1, %v5125_v0  ;;  %445 = vmatprep.mubr.f32.mxu0 %v5052_v2  ;;  %v550_v31 = vsel %vm546_vm3, %v541_v24, %v543_v26  ;;  %v551_v40 = vsel %vm546_vm3, %v543_v26, %v545_v27 }
  0x8a   :  { %4823 = vmatprep.subr.msk.mxu0 %vm69_vm1, %v5158_v6 }
  0x8c   :  { %4822 = vmatmul.mubr.msk.f32.vlgmr.msra.gmra.mrb[2].mxu0 %vm65_vm2, %v35_v25  ;;  %v800_v29 = vpop.permute.xlu0 %799  ;;  %v802_v30 = vpop.permute.xlu1 %801 }
  0x8d   :  { %4824 = vmatpush1.msk.msra.mxu0 %vm69_vm1, %v5150_v5  ;;  %516 = vmatprep.mubr.f32.mxu0 %v5052_v2  ;;  %v811_v39 = vsel %vm809_vm4, %v800_v29, %v802_v30 }
  0x8e   :  { %4827 = vmatprep.subr.msk.mxu0 %vm69_vm1, %v548_v28 }
  0x90   :  { %4825 = vmatmul.mubr.msk.f32.vlgmr.msra.gmra.mrb[4].mxu0 %vm65_vm2, %v35_v25  ;;  %v798_v33 = vpop.permute.xlu0 %797  ;;  %v804_v34 = vpop.permute.xlu1 %803 }
  0x91   :  { %4828 = vmatpush1.msk.msra.mxu0 %vm69_vm1, %v547_v32  ;;  %631 = vmatprep.mubr.f32.mxu0 %v5052_v2  ;;  %v810_v44 = vsel %vm809_vm4, %v798_v33, %v800_v29  ;;  %v812_v48 = vsel %vm809_vm4, %v802_v30, %v804_v34  ;;  %v4876_v29 = vld [vmem:[%s5726_s1 + $0x38] sm:$0xff] }
  0x92   :  { %4830 = vmatprep.subr.msk.mxu0 %vm69_vm1, %v550_v31 }
  0x94   :  { %4829 = vmatmul.mubr.msk.f32.vlgmr.msra.gmra.mrb[0].mxu0 %vm65_vm2, %v4826_v35  ;;  %v806_v37 = vpop.permute.xlu0 %805  ;;  %v808_v38 = vpop.permute.xlu1 %807 }
  0x95   :  { %4831 = vmatpush1.msk.msra.mxu0 %vm69_vm1, %v549_v36  ;;  %702 = vmatprep.mubr.f32.mxu0 %v5052_v2  ;;  %v813_v43 = vsel %vm809_vm4, %v804_v34, %v806_v37  ;;  %v814_v52 = vsel %vm809_vm4, %v806_v37, %v808_v38 }
  0x96   :  { %4833 = vmatprep.subr.msk.mxu0 %vm69_vm1, %v545_v27 }
  0x98   :  { %4832 = vmatmul.mubr.msk.f32.vlgmr.msra.gmra.mrb[2].mxu0 %vm65_vm2, %v4826_v35  ;;  %v1063_v41 = vpop.permute.xlu0 %1062  ;;  %v1065_v42 = vpop.permute.xlu1 %1064 }
  0x99   :  { %4834 = vmatpush1.msk.msra.mxu0 %vm69_vm1, %v551_v40  ;;  %773 = vmatprep.mubr.f32.mxu0 %v5052_v2  ;;  %v1074_v51 = vsel %vm1072_vm5, %v1063_v41, %v1065_v42 }
  0x9a   :  { %4837 = vmatprep.subr.msk.mxu0 %vm69_vm1, %v811_v39  ;;  %v4886_v39 = vld [vmem:[%s5726_s1 + $0x40] sm:$0xff] }
  0x9c   :  { %4835 = vmatmul.mubr.msk.f32.vlgmr.msra.gmra.mrb[4].mxu0 %vm65_vm2, %v4826_v35  ;;  %v1061_v45 = vpop.permute.xlu0 %1060  ;;  %v1067_v46 = vpop.permute.xlu1 %1066 }
  0x9d   :  { %4838 = vmatpush1.msk.msra.mxu0 %vm69_vm1, %v810_v44  ;;  %894 = vmatprep.mubr.f32.mxu0 %v5052_v2  ;;  %v1073_v56 = vsel %vm1072_vm5, %v1061_v45, %v1063_v41  ;;  %v1075_v60 = vsel %vm1072_vm5, %v1065_v42, %v1067_v46 }
  0x9e   :  { %4840 = vmatprep.subr.msk.mxu0 %vm69_vm1, %v813_v43  ;;  %v2378_v43 = vlaneseq }
  0xa0   :  { %4839 = vmatmul.mubr.msk.f32.vlgmr.msra.gmra.mrb[0].mxu0 %vm65_vm2, %v4836_v47  ;;  %v1069_v49 = vpop.permute.xlu0 %1068  ;;  %v1071_v50 = vpop.permute.xlu1 %1070  ;;  %v2379_v44 = vshrl.u32 %v2378_v43, 7 }
  0xa1   :  { %4841 = vmatpush1.msk.msra.mxu0 %vm69_vm1, %v812_v48  ;;  %965 = vmatprep.mubr.f32.mxu0 %v5052_v2  ;;  %v1076_v55 = vsel %vm1072_vm5, %v1067_v46, %v1069_v49  ;;  %v1077_v0 = vsel %vm1072_vm5, %v1069_v49, %v1071_v50  ;;  %v2376_v46 = vld [vmem:[%s5727_s9] sm:$0x3f] }
  0xa2   :  { %4843 = vmatprep.subr.msk.mxu0 %vm69_vm1, %v808_v38  ;;  %v2380_v45 = vsub.s32 0, %v2379_v44  ;;  %v2388_v49 = vsub.s32 2, %v2379_v44 }
  0xa4   :  { %4842 = vmatmul.mubr.msk.f32.vlgmr.msra.gmra.mrb[2].mxu0 %vm65_vm2, %v4836_v47  ;;  %v1326_v53 = vpop.permute.xlu0 %1325  ;;  %v1328_v54 = vpop.permute.xlu1 %1327 }
  0xa5   :  { %4844 = vmatpush1.msk.msra.mxu0 %vm69_vm1, %v814_v52  ;;  %1036 = vmatprep.mubr.f32.mxu0 %v5052_v2  ;;  %v1337_v63 = vsel %vm1335_vm6, %v1326_v53, %v1328_v54 }
  0xa6   :  { %4847 = vmatprep.subr.msk.mxu0 %vm69_vm1, %v1074_v51 }
  0xa8   :  { %4845 = vmatmul.mubr.msk.f32.vlgmr.msra.gmra.mrb[4].mxu0 %vm65_vm2, %v4836_v47  ;;  %v1324_v57 = vpop.permute.xlu0 %1323  ;;  %v1330_v58 = vpop.permute.xlu1 %1329  ;;  %v2384_v47 = vsub.s32 1, %v2379_v44 }
  0xa9   :  { %4848 = vmatpush1.msk.msra.mxu0 %vm69_vm1, %v1073_v56  ;;  %1157 = vmatprep.mubr.f32.mxu0 %v5052_v2  ;;  %v1336_v5 = vsel %vm1335_vm6, %v1324_v57, %v1326_v53  ;;  %v1338_v9 = vsel %vm1335_vm6, %v1328_v54, %v1330_v58  ;;  %v2392_v53 = vsub.s32 3, %v2379_v44  ;;  %v5412_v57 = vrot.slane %v2376_v46, %v2388_v49 }
  0xaa   :  { %4850 = vmatprep.subr.msk.mxu0 %vm69_vm1, %v1076_v55  ;;  %v5406_v52 = vrot.slane %v2376_v46, %v2384_v47 }
  0xac   :  { %4849 = vmatmul.mubr.msk.f32.vlgmr.msra.gmra.mrb[0].mxu0 %vm65_vm2, %v4846_v59  ;;  %v1332_v61 = vpop.permute.xlu0 %1331  ;;  %v1334_v62 = vpop.permute.xlu1 %1333 }
  0xad   :  { %4851 = vmatpush1.msk.msra.mxu0 %vm69_vm1, %v1075_v60  ;;  %1228 = vmatprep.mubr.f32.mxu0 %v5052_v2  ;;  %v1339_v4 = vsel %vm1335_vm6, %v1330_v58, %v1332_v61  ;;  %v1340_v13 = vsel %vm1335_vm6, %v1332_v61, %v1334_v62  ;;  %v2396_v58 = vsub.s32 4, %v2379_v44 }
  0xae   :  { %4853 = vmatprep.subr.msk.mxu0 %vm69_vm1, %v1071_v50  ;;  %v5404_v50 = vrot.slane %v2376_v46, %v2380_v45 }
  0xb0   :  { %4852 = vmatmul.mubr.msk.f32.vlgmr.msra.gmra.mrb[2].mxu0 %vm65_vm2, %v4846_v59  ;;  %v1589_v1 = vpop.permute.xlu0 %1588  ;;  %v1591_v3 = vpop.permute.xlu1 %1590 }
  0xb1   :  { %4854 = vmatpush1.msk.msra.mxu0 %vm69_vm1, %v1077_v0  ;;  %1299 = vmatprep.mubr.f32.mxu0 %v5052_v2  ;;  %v1600_v12 = vsel %vm1598_vm7, %v1589_v1, %v1591_v3 }
  0xb2   :  { %4857 = vmatprep.subr.msk.mxu0 %vm69_vm1, %v1337_v63  ;;  %v2400_v63 = vsub.s32 5, %v2379_v44 }
  0xb4   :  { %4855 = vmatmul.mubr.msk.f32.vlgmr.msra.gmra.mrb[4].mxu0 %vm65_vm2, %v4846_v59  ;;  %v1587_v6 = vpop.permute.xlu0 %1586  ;;  %v1593_v7 = vpop.permute.xlu1 %1592 }
  0xb5   :  { %4858 = vmatpush1.msk.msra.mxu0 %vm69_vm1, %v1336_v5  ;;  %1420 = vmatprep.mubr.f32.mxu0 %v5052_v2  ;;  %v1599_v17 = vsel %vm1598_vm7, %v1587_v6, %v1589_v1  ;;  %v1601_v21 = vsel %vm1598_vm7, %v1591_v3, %v1593_v7 }
  0xb6   :  { %4860 = vmatprep.subr.msk.mxu0 %vm69_vm1, %v1339_v4 }
  0xb8   :  { %4859 = vmatmul.mubr.msk.f32.vlgmr.msra.gmra.mrb[0].mxu0 %vm65_vm2, %v4856_v8  ;;  %v1595_v10 = vpop.permute.xlu0 %1594  ;;  %v1597_v11 = vpop.permute.xlu1 %1596 }
  0xb9   :  { %4861 = vmatpush1.msk.msra.mxu0 %vm69_vm1, %v1338_v9  ;;  %1491 = vmatprep.mubr.f32.mxu0 %v5052_v2  ;;  %v1602_v16 = vsel %vm1598_vm7, %v1593_v7, %v1595_v10  ;;  %v1603_v24 = vsel %vm1598_vm7, %v1595_v10, %v1597_v11  ;;  %v5430_v10 = vrot.slane %v2376_v46, %v2400_v63 }
  0xba   :  { %4863 = vmatprep.subr.msk.mxu0 %vm69_vm1, %v1334_v62  ;;  %v5418_v62 = vrot.slane %v2376_v46, %v2392_v53 }
  0xbc   :  { %4862 = vmatmul.mubr.msk.f32.vlgmr.msra.gmra.mrb[2].mxu0 %vm65_vm2, %v4856_v8  ;;  %v1852_v14 = vpop.permute.xlu0 %1851  ;;  %v1854_v15 = vpop.permute.xlu1 %1853 }
  0xbd   :  { %4864 = vmatpush1.msk.msra.mxu0 %vm69_vm1, %v1340_v13  ;;  %1562 = vmatprep.mubr.f32.mxu0 %v5052_v2  ;;  %v1863_v23 = vsel %vm1861_vm8, %v1852_v14, %v1854_v15 }
  0xbe   :  { %4867 = vmatprep.subr.msk.mxu0 %vm69_vm1, %v1600_v12 }
  0xc0   :  { %4865 = vmatmul.mubr.msk.f32.vlgmr.msra.gmra.mrb[4].mxu0 %vm65_vm2, %v4856_v8  ;;  %v1850_v18 = vpop.permute.xlu0 %1849  ;;  %v1856_v20 = vpop.permute.xlu1 %1855  ;;  %v5428_v8 = vrot.slane %v2376_v46, %v2396_v58 }
  0xc1   :  { %4868 = vmatpush1.msk.msra.mxu0 %vm69_vm1, %v1599_v17  ;;  %1683 = vmatprep.mubr.f32.mxu0 %v5052_v2  ;;  %v1862_v28 = vsel %vm1861_vm8, %v1850_v18, %v1852_v14  ;;  %v1864_v32 = vsel %vm1861_vm8, %v1854_v15, %v1856_v20 }
  0xc2   :  { %4870 = vmatprep.subr.msk.mxu0 %vm69_vm1, %v1602_v16 }
  0xc4   :  { %4869 = vmatmul.mubr.msk.f32.vlgmr.msra.gmra.mrb[0].mxu0 %vm65_vm2, %v4866_v19  ;;  %v1858_v22 = vpop.permute.xlu0 %1857  ;;  %v1860_v25 = vpop.permute.xlu1 %1859 }
  0xc5   :  { %4871 = vmatpush1.msk.msra.mxu0 %vm69_vm1, %v1601_v21  ;;  %1754 = vmatprep.mubr.f32.mxu0 %v5052_v2  ;;  %v1865_v27 = vsel %vm1861_vm8, %v1856_v20, %v1858_v22  ;;  %v1866_v34 = vsel %vm1861_vm8, %v1858_v22, %v1860_v25 }
  0xc6   :  { %4873 = vmatprep.subr.msk.mxu0 %vm69_vm1, %v1597_v11 }
  0xc8   :  { %4872 = vmatmul.mubr.msk.f32.vlgmr.msra.gmra.mrb[2].mxu0 %vm65_vm2, %v4866_v19  ;;  %v2115_v26 = vpop.permute.xlu0 %2114  ;;  %v2117_v30 = vpop.permute.xlu1 %2116 }
  0xc9   :  { %4874 = vmatpush1.msk.msra.mxu0 %vm69_vm1, %v1603_v24  ;;  %1825 = vmatprep.mubr.f32.mxu0 %v5052_v2  ;;  %v2126_v33 = vsel %vm2124_vm9, %v2115_v26, %v2117_v30 }
  0xca   :  { %4877 = vmatprep.subr.msk.mxu0 %vm69_vm1, %v1863_v23 }
  0xcc   :  { %4875 = vmatmul.mubr.msk.f32.vlgmr.msra.gmra.mrb[4].mxu0 %vm65_vm2, %v4866_v19  ;;  %v2113_v31 = vpop.permute.xlu0 %2112  ;;  %v2119_v35 = vpop.permute.xlu1 %2118 }
  0xcd   :  { %4878 = vmatpush1.msk.msra.mxu0 %vm69_vm1, %v1862_v28  ;;  %1946 = vmatprep.mubr.f32.mxu0 %v5052_v2  ;;  %v2125_v38 = vsel %vm2124_vm9, %v2113_v31, %v2115_v26  ;;  %v2127_v40 = vsel %vm2124_vm9, %v2117_v30, %v2119_v35 }
  0xce   :  { %4880 = vmatprep.subr.msk.mxu0 %vm69_vm1, %v1865_v27 }
  0xd0   :  { %4879 = vmatmul.mubr.msk.f32.vlgmr.msra.gmra.mrb[0].mxu0 %vm65_vm2, %v4876_v29  ;;  %v2121_v36 = vpop.permute.xlu0 %2120  ;;  %v2123_v41 = vpop.permute.xlu1 %2122 }
  0xd1   :  { %4881 = vmatpush1.msk.msra.mxu0 %vm69_vm1, %v1864_v32  ;;  %2017 = vmatprep.mubr.f32.mxu0 %v5052_v2  ;;  %v2128_v37 = vsel %vm2124_vm9, %v2119_v35, %v2121_v36  ;;  %v2129_v42 = vsel %vm2124_vm9, %v2121_v36, %v2123_v41 }
  0xd2   :  { %4883 = vmatprep.subr.msk.mxu0 %vm69_vm1, %v1860_v25 }
  0xd4   :  { %4882 = vmatmul.mubr.msk.f32.vlgmr.msra.gmra.mrb[2].mxu0 %vm65_vm2, %v4876_v29 }
  0xd5   :  { %4884 = vmatpush1.msk.msra.mxu0 %vm69_vm1, %v1866_v34  ;;  %2088 = vmatprep.mubr.f32.mxu0 %v5052_v2 }
  0xd6   :  { %4887 = vmatprep.subr.msk.mxu0 %vm69_vm1, %v2126_v33 }
  0xd8   :  { %4885 = vmatmul.mubr.msk.f32.vlgmr.msra.gmra.mrb[4].mxu0 %vm65_vm2, %v4876_v29 }
  0xd9   :  { %4888 = vmatpush1.msk.msra.mxu0 %vm69_vm1, %v2125_v38  ;;  %2209 = vmatprep.mubr.f32.mxu0 %v5052_v2 }
  0xda   :  { %4890 = vmatprep.subr.msk.mxu0 %vm69_vm1, %v2128_v37 }
  0xdc   :  { %4889 = vmatmul.mubr.msk.f32.vlgmr.msra.gmra.mrb[0].mxu0 %vm65_vm2, %v4886_v39 }
  0xdd   :  { %4891 = vmatpush1.msk.msra.mxu0 %vm69_vm1, %v2127_v40  ;;  %2280 = vmatprep.mubr.f32.mxu0 %v5052_v2 }
  0xde   :  { %4893 = vmatprep.subr.msk.mxu0 %vm69_vm1, %v2123_v41 }
  0xe0   :  { %4892 = vmatmul.mubr.msk.f32.vlgmr.msra.gmra.mrb[2].mxu0 %vm65_vm2, %v4886_v39 }
  0xe1   :  { %4894 = vmatpush1.msk.msra.mxu0 %vm69_vm1, %v2129_v42  ;;  %2351 = vmatprep.mubr.f32.mxu0 %v5052_v2  ;;  %v2368_v48 = vpop.permute.xlu0 %2367  ;;  %v2445_v42 = vld [vmem:[%s5729_s4] sm:$0xff]  ;;  %s5064_s4 = smov 17   ;;  %vm3984_vm1 = vcmask 908288  }
  0xe4   :  { %4895 = vmatmul.mubr.msk.f32.vlgmr.msra.gmra.mrb[4].mxu0 %vm65_vm2, %v4886_v39  ;;  %v2441_v39 = vld [vmem:[%s5728_s3] sm:$0xff]  ;;  %s5063_s3 = smov 19  }
 0x1af   :  { %v2211_v51 = vpop.f32.mrb[0].mxu0 }
 0x1b0   :  { %v5408_v54 = vadd.f32 %v2368_v48, %v2211_v51  ;;  %v2213_v55 = vpop.f32.mrb[1].mxu0 }
 0x1b1   :  { %v5410_v56 = vadd.f32 %v2368_v48, %v2213_v55 }
 0x1b2   :  { %v2408_v59 = vmul.f32 %v5404_v50, %v5408_v54 }
 0x1b3   :  { %v2409_v60 = vmul.f32 %v5406_v52, %v5410_v56  ;;  %v2282_v61 = vpop.f32.mrb[2].mxu0 }
 0x1b4   :  { %v5420_v0 = vadd.f32 %v2368_v48, %v2282_v61  ;;  %v2284_v1 = vpop.f32.mrb[3].mxu0  ;;  %v2423_v3 = vmul.f32 %v2408_v59, %v5408_v54 }
 0x1b5   :  { %v2424_v4 = vmul.f32 %v2409_v60, %v5410_v56  ;;  %v5424_v5 = vadd.f32 %v2368_v48, %v2284_v1  ;;  %v2414_v6 = vadd.f32 %v2409_v60, %v2408_v59 }
 0x1b6   :  { %v2410_v7 = vmul.f32 %v5412_v57, %v5420_v0 }
 0x1b7   :  { %v2353_v9 = vpop.f32.mrb[4].mxu0  ;;  %v2411_v11 = vmul.f32 %v5418_v62, %v5424_v5  ;;  %v2429_v12 = vadd.f32 %v2424_v4, %v2423_v3 }
 0x1b8   :  { %v2425_v13 = vmul.f32 %v2410_v7, %v5420_v0  ;;  %v5435_v14 = vadd.f32 %v2368_v48, %v2353_v9  ;;  %v2355_v15 = vpop.f32.mrb[5].mxu0  ;;  %v2415_v16 = vadd.f32 %v2414_v6, %v2410_v7 }
 0x1b9   :  { %v5437_v17 = vadd.f32 %v2368_v48, %v2355_v15  ;;  %v2426_v18 = vmul.f32 %v2411_v11, %v5424_v5 }
 0x1ba   :  { %v2412_v19 = vmul.f32 %v5428_v8, %v5435_v14  ;;  %v2416_v20 = vadd.f32 %v2415_v16, %v2411_v11  ;;  %v2430_v21 = vadd.f32 %v2429_v12, %v2425_v13 }
 0x1bb   :  { %v2413_v22 = vmul.f32 %v5430_v10, %v5437_v17 }
 0x1bc   :  { %v2417_v23 = vadd.f32 %v2416_v20, %v2412_v19  ;;  %v2427_v24 = vmul.f32 %v2412_v19, %v5435_v14  ;;  %v2431_v25 = vadd.f32 %v2430_v21, %v2426_v18  ;;  %v4712_v21 = vld [vmem:[%s5730_s6] sm:$0xff] }
 0x1bd   :  { %v2419_v26 = vsel %vm2418_vm10, %v2413_v22, 0.0  ;;  %v2428_v27 = vmul.f32 %v2413_v22, %v5437_v17 }
 0x1be   :  { %v2420_v28 = vadd.f32 %v2419_v26, %v2417_v23  ;;  %v2432_v29 = vadd.f32 %v2431_v25, %v2427_v24 }
 0x1bf   :  { %v2433_v30 = vsel %vm2418_vm10, %v2428_v27, 0.0 }
 0x1c0   :  { %2421 = vadd.xlane.f32.xlu1 %v2420_v28  ;;  %v2434_v31 = vadd.f32 %v2433_v30, %v2432_v29  ;;  %v4896_v28 = vld [vmem:[%s5731_s5 + $0x8] sm:$0xff] }
 0x1c2   :  { %2435 = vadd.xlane.f32.xlu0 %v2434_v31 }
 0x24d   :  { %v2422_v32 = vpop.xlane.xlu1 %2421 }
 0x24e   :  { %v2437_v33 = vmul.f32 0.001953125, %v2422_v32 }
 0x24f   :  { %v2436_v34 = vpop.xlane.xlu0 %2435 }
 0x250   :  { %v2439_v35 = vmul.f32 %v2437_v33, %v2437_v33  ;;  %v2438_v36 = vmul.f32 0.001953125, %v2436_v34 }
 0x252   :  { %v2440_v37 = vsub.f32 %v2438_v36, %v2439_v35 }
 0x254   :  { %v2442_v38 = vadd.f32 1e-05, %v2440_v37 }
 0x256   :  { %5047 = vrsqrt.f32 %v2442_v38 }
 0x260   :  { %v5048_v40 = vpop.eup %5047 }
 0x261   :  { %v2444_v41 = vmul.f32 %v5048_v40, %v2441_v39  ;;  %v2491_v40 = vld [vmem:[%s5731_s5] sm:$0xff] }
 0x263   :  { %2450 = vperm.xlu1 %5043, %v2444_v41   ;;  %v2446_v43 = vmul.f32 %v2444_v41, %v2437_v33 }
 0x265   :  { %v2447_v44 = vsub.f32 %v2445_v42, %v2446_v43 }
 0x267   :  { %2461 = vperm.xlu0 %5042, %v2447_v44  }
 0x26b   :  { %2506 = vrot.lane.b32.xlu0 %v5052_v2, %s5062_s30 }
 0x2e2   :  { %v2451_v45 = vpop.permute.xlu1 %2450 }
 0x2e3   :  { %v2453_v46 = vmul.f32 %v2451_v45, %v5408_v54  ;;  %v2454_v47 = vmul.f32 %v2451_v45, %v5410_v56  ;;  %v2455_v48 = vmul.f32 %v2451_v45, %v5420_v0  ;;  %v2456_v49 = vmul.f32 %v2451_v45, %v5424_v5 }
 0x2e4   :  { %v2457_v51 = vmul.f32 %v2451_v45, %v5435_v14  ;;  %v2458_v53 = vmul.f32 %v2451_v45, %v5437_v17 }
 0x2e6   :  { %v2462_v55 = vpop.permute.xlu0 %2461 }
 0x2e7   :  { %v2464_v58 = vadd.f32 %v2462_v55, %v2453_v46  ;;  %v2465_v59 = vadd.f32 %v2462_v55, %v2454_v47  ;;  %v2466_v60 = vadd.f32 %v2462_v55, %v2455_v48  ;;  %v2467_v61 = vadd.f32 %v2462_v55, %v2456_v49 }
 0x2e8   :  { %v2468_v63 = vadd.f32 %v2462_v55, %v2457_v51  ;;  %v2469_v1 = vadd.f32 %v2462_v55, %v2458_v53  ;;  %v4903_v55 = vld [vmem:[%s5731_s5 + $0x10] sm:$0xff] }
 0x2e9   :  { %v2470_v3 = vmax.f32 %v2464_v58, 0.0  ;;  %v2471_v4 = vmax.f32 %v2465_v59, 0.0  ;;  %v2472_v6 = vmax.f32 %v2466_v60, 0.0  ;;  %v2473_v7 = vmax.f32 %v2467_v61, 0.0 }
 0x2ea   :  { %v2474_v9 = vmax.f32 %v2468_v63, 0.0  ;;  %v2475_v11 = vmax.f32 %v2469_v1, 0.0  ;;  %v2507_v22 = vpop.permute.xlu0 %2506  ;;  %v5592_v1 = vld [vmem:[#allocation2] sm:$0xff] }
 0x2eb   :  { %v5463_v12 = vmul.f32 %v2470_v3, %v5404_v50  ;;  %v5466_v13 = vmul.f32 %v2471_v4, %v5406_v52  ;;  %v5469_v15 = vmul.f32 %v2472_v6, %v5412_v57  ;;  %v5472_v16 = vmul.f32 %v2473_v7, %v5418_v62 }
 0x2ec   :  { %v5475_v18 = vmul.f32 %v2474_v9, %v5428_v8  ;;  %v2481_v19 = vmul.f32 %v2475_v11, %v5430_v10  ;;  %v4907_v11 = vld [vmem:[%s5731_s5 + $0x18] sm:$0xff] }
 0x2ed   :  { %2514 = vrot.lane.b32.xlu0 %v5472_v16, %s5062_s30  ;;  %2508 = vrot.lane.b32.xlu1 %v5463_v12, %s5062_s30 }
 0x2ee   :  { %2488 = vst.msk [vmem:[#allocation2 + $0x30] sm:$0xff] %vm2418_vm10, %v2481_v19 }
 0x2ef   :  { %2490 = vst.msk [vmem:[#allocation2 + $0x30] sm:$0xff] %vm2489_vm11, %v5052_v2 }
 0x2f1   :  { %2746 = vrot.lane.b32.xlu0 %v5052_v2, %s5063_s3  ;;  %2510 = vrot.lane.b32.xlu1 %v5466_v13, %s5062_s30 }
 0x2f5   :  { %2748 = vrot.lane.b32.xlu0 %v5463_v12, %s5063_s3  ;;  %2512 = vrot.lane.b32.xlu1 %v5469_v15, %s5062_s30 }
 0x2f6   :  { %v5505_v20 = vld [vmem:[#allocation2 + $0x30] sm:$0xff] }
 0x2f9   :  { %2754 = vrot.lane.b32.xlu0 %v5472_v16, %s5063_s3  ;;  %2516 = vrot.lane.b32.xlu1 %v5475_v18, %s5062_s30 }
 0x2fd   :  { %2988 = vrot.lane.b32.xlu0 %v5052_v2, %s5064_s4  ;;  %2750 = vrot.lane.b32.xlu1 %v5466_v13, %s5063_s3 }
 0x301   :  { %2990 = vrot.lane.b32.xlu0 %v5463_v12, %s5064_s4  ;;  %2752 = vrot.lane.b32.xlu1 %v5469_v15, %s5063_s3 }
 0x305   :  { %2996 = vrot.lane.b32.xlu0 %v5472_v16, %s5064_s4  ;;  %2756 = vrot.lane.b32.xlu1 %v5475_v18, %s5063_s3 }
 0x309   :  { %3250 = vrot.lane.b32.xlu0 %v5052_v2, %s5065_s11  ;;  %2992 = vrot.lane.b32.xlu1 %v5466_v13, %s5064_s4 }
 0x30d   :  { %3252 = vrot.lane.b32.xlu0 %v5463_v12, %s5065_s11  ;;  %2994 = vrot.lane.b32.xlu1 %v5469_v15, %s5064_s4 }
 0x311   :  { %3258 = vrot.lane.b32.xlu0 %v5472_v16, %s5065_s11  ;;  %2998 = vrot.lane.b32.xlu1 %v5475_v18, %s5064_s4 }
 0x315   :  { %3262 = vrot.lane.b32.xlu0 %v5505_v20, %s5065_s11  ;;  %3254 = vrot.lane.b32.xlu1 %v5466_v13, %s5065_s11 }
 0x319   :  { %3729 = vrot.lane.b32.xlu0 %v5469_v15, %s5053_s17  ;;  %3256 = vrot.lane.b32.xlu1 %v5469_v15, %s5065_s11 }
 0x31d   :  { %3731 = vrot.lane.b32.xlu0 %v5472_v16, %s5053_s17  ;;  %3260 = vrot.lane.b32.xlu1 %v5475_v18, %s5065_s11 }
 0x321   :  { %3735 = vrot.lane.b32.xlu0 %v5505_v20, %s5053_s17  ;;  %3727 = vrot.lane.b32.xlu1 %v5466_v13, %s5053_s17 }
 0x325   :  { %3976 = vrot.lane.b32.xlu0 %v5469_v15, %s5066_s12  ;;  %3725 = vrot.lane.b32.xlu1 %v5463_v12, %s5053_s17 }
 0x329   :  { %3978 = vrot.lane.b32.xlu0 %v5472_v16, %s5066_s12  ;;  %3733 = vrot.lane.b32.xlu1 %v5475_v18, %s5053_s17 }
 0x32d   :  { %3982 = vrot.lane.b32.xlu0 %v5505_v20, %s5066_s12  ;;  %3974 = vrot.lane.b32.xlu1 %v5466_v13, %s5066_s12 }
 0x331   :  { %4224 = vrot.lane.b32.xlu0 %v5469_v15, %s5055_s0  ;;  %3972 = vrot.lane.b32.xlu1 %v5463_v12, %s5066_s12 }
 0x335   :  { %4226 = vrot.lane.b32.xlu0 %v5472_v16, %s5055_s0  ;;  %3980 = vrot.lane.b32.xlu1 %v5475_v18, %s5066_s12 }
 0x339   :  { %4230 = vrot.lane.b32.xlu0 %v5505_v20, %s5055_s0  ;;  %4222 = vrot.lane.b32.xlu1 %v5466_v13, %s5055_s0 }
 0x33d   :  { %4471 = vrot.lane.b32.xlu0 %v5469_v15, %s5056_s21  ;;  %4220 = vrot.lane.b32.xlu1 %v5463_v12, %s5055_s0 }
 0x341   :  { %4473 = vrot.lane.b32.xlu0 %v5472_v16, %s5056_s21  ;;  %4228 = vrot.lane.b32.xlu1 %v5475_v18, %s5055_s0 }
 0x345   :  { %4469 = vrot.lane.b32.xlu1 %v5466_v13, %s5056_s21  ;;  %4477 = vrot.lane.b32.xlu0 %v5505_v20, %s5056_s21 }
 0x349   :  { %4467 = vrot.lane.b32.xlu1 %v5463_v12, %s5056_s21 }
 0x34d   :  { %4475 = vrot.lane.b32.xlu1 %v5475_v18, %s5056_s21 }
 0x351   :  { %4715 = vperm.xlu1 %5043, %v4712_v21  }
 0x35f   :  { %v2509_v23 = vpop.permute.xlu1 %2508  ;;  %v2515_v24 = vpop.permute.xlu0 %2514 }
 0x360   :  { %v2519_v29 = vsel %vm2518_vm12, %v2507_v22, %v2509_v23 }
 0x363   :  { %v2511_v25 = vpop.permute.xlu1 %2510  ;;  %v2747_v26 = vpop.permute.xlu0 %2746 }
 0x364   :  { %v2520_v27 = vsel %vm2518_vm12, %v2509_v23, %v2511_v25 }
 0x365   :  { %2533 = vmatprep.subr.mxu1 %v2520_v27 }
 0x366   :  { %2534 = vmatpush1.msra.mxu1 %v2519_v29 }
 0x367   :  { %v2513_v30 = vpop.permute.xlu1 %2512  ;;  %4897 = vmatmul.mubr.msk.f32.vlgmr.msra.gmra.mrb[0].mxu1 %vm2418_vm10, %v4896_v28  ;;  %v2749_v31 = vpop.permute.xlu0 %2748 }
 0x368   :  { %v2521_v32 = vsel %vm2518_vm12, %v2511_v25, %v2513_v30  ;;  %v2522_v33 = vsel %vm2518_vm12, %v2513_v30, %v2515_v24  ;;  %2668 = vmatprep.mubr.f32.mxu1 %v5052_v2  ;;  %v2759_v41 = vsel %vm2758_vm13, %v2747_v26, %v2749_v31 }
 0x369   :  { %2604 = vmatprep.subr.mxu1 %v2522_v33 }
 0x36a   :  { %2605 = vmatpush1.msra.mxu1 %v2521_v32 }
 0x36b   :  { %v2517_v34 = vpop.permute.xlu1 %2516  ;;  %4898 = vmatmul.mubr.msk.f32.vlgmr.msra.gmra.mrb[2].mxu1 %vm2418_vm10, %v4896_v28  ;;  %v2755_v35 = vpop.permute.xlu0 %2754 }
 0x36c   :  { %v2523_v36 = vsel %vm2518_vm12, %v2515_v24, %v2517_v34  ;;  %2675 = vmatprep.subr.mxu1 %v2517_v34  ;;  %2739 = vmatprep.mubr.f32.mxu1 %v5052_v2 }
 0x36d   :  { %2676 = vmatpush1.msra.mxu1 %v2523_v36 }
 0x36f   :  { %v2751_v37 = vpop.permute.xlu1 %2750  ;;  %4899 = vmatmul.mubr.msk.f32.vlgmr.msra.gmra.mrb[4].mxu1 %vm2418_vm10, %v4896_v28  ;;  %v2989_v38 = vpop.permute.xlu0 %2988 }
 0x370   :  { %v2760_v39 = vsel %vm2758_vm13, %v2749_v31, %v2751_v37  ;;  %2837 = vmatprep.mubr.f32.mxu1 %v5052_v2  ;;  %v4911_v31 = vld [vmem:[%s5731_s5 + $0x20] sm:$0xff] }
 0x371   :  { %2773 = vmatprep.subr.mxu1 %v2760_v39 }
 0x372   :  { %2774 = vmatpush1.msra.mxu1 %v2759_v41 }
 0x373   :  { %v2753_v42 = vpop.permute.xlu1 %2752  ;;  %4900 = vmatmul.mubr.msk.f32.vlgmr.msra.gmra.mrb[0].mxu1 %vm2418_vm10, %v2491_v40  ;;  %v2991_v43 = vpop.permute.xlu0 %2990 }
 0x374   :  { %v2761_v44 = vsel %vm2758_vm13, %v2751_v37, %v2753_v42  ;;  %v2762_v45 = vsel %vm2758_vm13, %v2753_v42, %v2755_v35  ;;  %2908 = vmatprep.mubr.f32.mxu1 %v5052_v2  ;;  %v3001_v58 = vsel %vm3000_vm14, %v2989_v38, %v2991_v43 }
 0x375   :  { %2844 = vmatprep.subr.mxu1 %v2762_v45  ;;  %v4919_v45 = vld [vmem:[%s5731_s5 + $0x30] sm:$0xff] }
 0x376   :  { %2845 = vmatpush1.msra.mxu1 %v2761_v44 }
 0x377   :  { %v2757_v46 = vpop.permute.xlu1 %2756  ;;  %4901 = vmatmul.mubr.msk.f32.vlgmr.msra.gmra.mrb[2].mxu1 %vm2418_vm10, %v2491_v40  ;;  %v2997_v47 = vpop.permute.xlu0 %2996 }
 0x378   :  { %v2763_v48 = vsel %vm2758_vm13, %v2755_v35, %v2757_v46  ;;  %2915 = vmatprep.subr.mxu1 %v2757_v46  ;;  %2979 = vmatprep.mubr.f32.mxu1 %v5052_v2 }
 0x379   :  { %2916 = vmatpush1.msra.mxu1 %v2763_v48 }
 0x37b   :  { %v2993_v49 = vpop.permute.xlu1 %2992  ;;  %4902 = vmatmul.mubr.msk.f32.vlgmr.msra.gmra.mrb[4].mxu1 %vm2418_vm10, %v2491_v40  ;;  %v3251_v51 = vpop.permute.xlu0 %3250 }
 0x37c   :  { %v3002_v53 = vsel %vm3000_vm14, %v2991_v43, %v2993_v49  ;;  %3079 = vmatprep.mubr.f32.mxu1 %v5052_v2 }
 0x37d   :  { %3015 = vmatprep.subr.mxu1 %v3002_v53 }
 0x37e   :  { %3016 = vmatpush1.msra.mxu1 %v3001_v58 }
 0x37f   :  { %v2995_v59 = vpop.permute.xlu1 %2994  ;;  %4904 = vmatmul.mubr.msk.f32.vlgmr.msra.gmra.mrb[0].mxu1 %vm2418_vm10, %v4903_v55  ;;  %v3253_v60 = vpop.permute.xlu0 %3252 }
 0x380   :  { %v3003_v61 = vsel %vm3000_vm14, %v2993_v49, %v2995_v59  ;;  %v3004_v63 = vsel %vm3000_vm14, %v2995_v59, %v2997_v47  ;;  %3150 = vmatprep.mubr.f32.mxu1 %v5592_v1  ;;  %v3265_v19 = vsel %vm3264_vm15, %v3251_v51, %v3253_v60 }
 0x381   :  { %3086 = vmatprep.subr.mxu1 %v3004_v63 }
 0x382   :  { %3087 = vmatpush1.msra.mxu1 %v3003_v61  ;;  %v4923_v61 = vld [vmem:[%s5731_s5 + $0x38] sm:$0xff] }
 0x383   :  { %v2999_v2 = vpop.permute.xlu1 %2998  ;;  %4905 = vmatmul.mubr.msk.f32.vlgmr.msra.gmra.mrb[2].mxu1 %vm2418_vm10, %v4903_v55  ;;  %v3259_v3 = vpop.permute.xlu0 %3258 }
 0x384   :  { %v3005_v4 = vsel %vm3000_vm14, %v2997_v47, %v2999_v2  ;;  %3157 = vmatprep.subr.mxu1 %v2999_v2  ;;  %3221 = vmatprep.mubr.f32.mxu1 %v5592_v1 }
 0x385   :  { %3158 = vmatpush1.msra.mxu1 %v3005_v4 }
 0x387   :  { %v3255_v6 = vpop.permute.xlu1 %3254  ;;  %4906 = vmatmul.mubr.msk.f32.vlgmr.msra.gmra.mrb[4].mxu1 %vm2418_vm10, %v4903_v55  ;;  %v3263_v7 = vpop.permute.xlu0 %3262 }
 0x388   :  { %v3266_v9 = vsel %vm3264_vm15, %v3253_v60, %v3255_v6  ;;  %3344 = vmatprep.mubr.f32.mxu1 %v5592_v1 }
 0x389   :  { %3280 = vmatprep.subr.mxu1 %v3266_v9 }
 0x38a   :  { %3281 = vmatpush1.msra.mxu1 %v3265_v19 }
 0x38b   :  { %v3257_v21 = vpop.permute.xlu1 %3256  ;;  %4908 = vmatmul.mubr.msk.f32.vlgmr.msra.gmra.mrb[0].mxu1 %vm2418_vm10, %v4907_v11  ;;  %v3730_v22 = vpop.permute.xlu0 %3729 }
 0x38c   :  { %v3267_v23 = vsel %vm3264_vm15, %v3255_v6, %v3257_v21  ;;  %v3268_v24 = vsel %vm3264_vm15, %v3257_v21, %v3259_v3  ;;  %3415 = vmatprep.mubr.f32.mxu1 %v5592_v1  ;;  %v4927_v21 = vld [vmem:[%s5731_s5 + $0x40] sm:$0xff] }
 0x38d   :  { %3351 = vmatprep.subr.mxu1 %v3268_v24 }
 0x38e   :  { %3352 = vmatpush1.msra.mxu1 %v3267_v23 }
 0x38f   :  { %v3261_v25 = vpop.permute.xlu1 %3260  ;;  %4909 = vmatmul.mubr.msk.f32.vlgmr.msra.gmra.mrb[2].mxu1 %vm2418_vm10, %v4907_v11  ;;  %v3732_v26 = vpop.permute.xlu0 %3731 }
 0x390   :  { %v3269_v27 = vsel %vm3264_vm15, %v3259_v3, %v3261_v25  ;;  %v3270_v28 = vsel %vm3264_vm15, %v3261_v25, %v3263_v7  ;;  %3486 = vmatprep.mubr.f32.mxu1 %v5592_v1 }
 0x391   :  { %3422 = vmatprep.subr.mxu1 %v3270_v28 }
 0x392   :  { %3423 = vmatpush1.msra.mxu1 %v3269_v27 }
 0x393   :  { %v3728_v29 = vpop.permute.xlu1 %3727  ;;  %4910 = vmatmul.mubr.msk.f32.vlgmr.msra.gmra.mrb[4].mxu1 %vm2418_vm10, %v4907_v11  ;;  %3504 = vmatprep.subr.mxu1 %v5466_v13  ;;  %v3736_v30 = vpop.permute.xlu0 %3735 }
 0x394   :  { %3505 = vmatpush1.msra.mxu1 %v5463_v12  ;;  %3568 = vmatprep.mubr.f32.mxu1 %v5592_v1  ;;  %v3738_v12 = vsel %vm59_vm0, %v3728_v29, %v3730_v22 }
 0x395   :  { %3575 = vmatprep.subr.mxu1 %v5472_v16 }
 0x397   :  { %v3726_v32 = vpop.permute.xlu1 %3725  ;;  %4912 = vmatmul.mubr.msk.f32.vlgmr.msra.gmra.mrb[0].mxu1 %vm2418_vm10, %v4911_v31  ;;  %v3977_v33 = vpop.permute.xlu0 %3976 }
 0x398   :  { %3576 = vmatpush1.msra.mxu1 %v5469_v15  ;;  %3639 = vmatprep.mubr.f32.mxu1 %v5592_v1  ;;  %v3737_v16 = vsel %vm59_vm0, %v3726_v32, %v3728_v29 }
 0x399   :  { %3646 = vmatprep.subr.mxu1 %v5505_v20  ;;  %v3739_v20 = vsel %vm59_vm0, %v3730_v22, %v3732_v26 }
 0x39b   :  { %v3734_v13 = vpop.permute.xlu1 %3733  ;;  %4913 = vmatmul.mubr.msk.f32.vlgmr.msra.gmra.mrb[2].mxu1 %vm2418_vm10, %v4911_v31  ;;  %v3979_v34 = vpop.permute.xlu0 %3978 }
 0x39c   :  { %3647 = vmatpush1.msra.mxu1 %v5475_v18  ;;  %3710 = vmatprep.mubr.f32.mxu1 %v5592_v1  ;;  %v3740_v15 = vsel %vm59_vm0, %v3732_v26, %v3734_v13  ;;  %v4915_v18 = vld [vmem:[%s5731_s5 + $0x28] sm:$0xff]  ;;  %v3741_v38 = vsel %vm59_vm0, %v3734_v13, %v3736_v30  ;;  %v3987_v46 = vsel %vm3984_vm1, %v3977_v33, %v3979_v34 }
 0x39d   :  { %3751 = vmatprep.subr.mxu1 %v3738_v12 }
 0x39f   :  { %v3975_v35 = vpop.permute.xlu1 %3974  ;;  %4914 = vmatmul.mubr.msk.f32.vlgmr.msra.gmra.mrb[4].mxu1 %vm2418_vm10, %v4911_v31  ;;  %v3983_v37 = vpop.permute.xlu0 %3982 }
 0x3a0   :  { %3752 = vmatpush1.msra.mxu1 %v3737_v16  ;;  %3815 = vmatprep.mubr.f32.mxu1 %v5592_v1  ;;  %v3986_v40 = vsel %vm3984_vm1, %v3975_v35, %v3977_v33 }
 0x3a1   :  { %3822 = vmatprep.subr.mxu1 %v3740_v15 }
 0x3a3   :  { %v3973_v36 = vpop.permute.xlu1 %3972  ;;  %4916 = vmatmul.mubr.msk.f32.vlgmr.msra.gmra.mrb[0].mxu1 %vm2418_vm10, %v4915_v18  ;;  %v4225_v42 = vpop.permute.xlu0 %4224 }
 0x3a4   :  { %3823 = vmatpush1.msra.mxu1 %v3739_v20  ;;  %3886 = vmatprep.mubr.f32.mxu1 %v5592_v1  ;;  %v3985_v41 = vsel %vm3984_vm1, %v3973_v36, %v3975_v35 }
 0x3a5   :  { %3893 = vmatprep.subr.mxu1 %v3736_v30 }
 0x3a7   :  { %v3981_v39 = vpop.permute.xlu1 %3980  ;;  %4917 = vmatmul.mubr.msk.f32.vlgmr.msra.gmra.mrb[2].mxu1 %vm2418_vm10, %v4915_v18  ;;  %v4227_v48 = vpop.permute.xlu0 %4226 }
 0x3a8   :  { %3894 = vmatpush1.msra.mxu1 %v3741_v38  ;;  %3957 = vmatprep.mubr.f32.mxu1 %v5592_v1  ;;  %v3988_v44 = vsel %vm3984_vm1, %v3979_v34, %v3981_v39  ;;  %v3989_v49 = vsel %vm3984_vm1, %v3981_v39, %v3983_v37  ;;  %v4234_v63 = vsel %vm809_vm4, %v4225_v42, %v4227_v48 }
 0x3a9   :  { %3999 = vmatprep.subr.mxu1 %v3986_v40 }
 0x3ab   :  { %v4223_v43 = vpop.permute.xlu1 %4222  ;;  %4918 = vmatmul.mubr.msk.f32.vlgmr.msra.gmra.mrb[4].mxu1 %vm2418_vm10, %v4915_v18  ;;  %v4231_v55 = vpop.permute.xlu0 %4230 }
 0x3ac   :  { %4000 = vmatpush1.msra.mxu1 %v3985_v41  ;;  %4063 = vmatprep.mubr.f32.mxu1 %v5592_v1  ;;  %v4233_v53 = vsel %vm809_vm4, %v4223_v43, %v4225_v42 }
 0x3ad   :  { %4070 = vmatprep.subr.mxu1 %v3988_v44 }
 0x3af   :  { %v4221_v47 = vpop.permute.xlu1 %4220  ;;  %4920 = vmatmul.mubr.msk.f32.vlgmr.msra.gmra.mrb[0].mxu1 %vm2418_vm10, %v4919_v45  ;;  %v4472_v3 = vpop.permute.xlu0 %4471 }
 0x3b0   :  { %4071 = vmatpush1.msra.mxu1 %v3987_v46  ;;  %4134 = vmatprep.mubr.f32.mxu1 %v5592_v1  ;;  %v4232_v58 = vsel %vm809_vm4, %v4221_v47, %v4223_v43 }
 0x3b1   :  { %4141 = vmatprep.subr.mxu1 %v3983_v37 }
 0x3b3   :  { %v4229_v51 = vpop.permute.xlu1 %4228  ;;  %4921 = vmatmul.mubr.msk.f32.vlgmr.msra.gmra.mrb[2].mxu1 %vm2418_vm10, %v4919_v45  ;;  %v4474_v9 = vpop.permute.xlu0 %4473 }
 0x3b4   :  { %4142 = vmatpush1.msra.mxu1 %v3989_v49  ;;  %4205 = vmatprep.mubr.f32.mxu1 %v5592_v1  ;;  %v4235_v60 = vsel %vm809_vm4, %v4227_v48, %v4229_v51  ;;  %v4236_v4 = vsel %vm809_vm4, %v4229_v51, %v4231_v55  ;;  %v4481_v22 = vsel %vm1072_vm5, %v4472_v3, %v4474_v9 }
 0x3b5   :  { %4246 = vmatprep.subr.mxu1 %v4233_v53 }
 0x3b7   :  { %v4470_v59 = vpop.permute.xlu1 %4469  ;;  %4922 = vmatmul.mubr.msk.f32.vlgmr.msra.gmra.mrb[4].mxu1 %vm2418_vm10, %v4919_v45  ;;  %v4478_v23 = vpop.permute.xlu0 %4477 }
 0x3b8   :  { %4247 = vmatpush1.msra.mxu1 %v4232_v58  ;;  %4310 = vmatprep.mubr.f32.mxu1 %v5592_v1  ;;  %v4480_v6 = vsel %vm1072_vm5, %v4470_v59, %v4472_v3  ;;  %v4760_v3 = vld [vmem:[%s5733_s8] sm:$0xff] }
 0x3b9   :  { %4317 = vmatprep.subr.mxu1 %v4235_v60 }
 0x3bb   :  { %v4468_v2 = vpop.permute.xlu1 %4467  ;;  %4924 = vmatmul.mubr.msk.f32.vlgmr.msra.gmra.mrb[0].mxu1 %vm2418_vm10, %v4923_v61 }
 0x3bc   :  { %4318 = vmatpush1.msra.mxu1 %v4234_v63  ;;  %4381 = vmatprep.mubr.f32.mxu1 %v5592_v1  ;;  %v4479_v11 = vsel %vm1072_vm5, %v4468_v2, %v4470_v59 }
 0x3bd   :  { %4388 = vmatprep.subr.mxu1 %v4231_v55 }
 0x3bf   :  { %4925 = vmatmul.mubr.msk.f32.vlgmr.msra.gmra.mrb[2].mxu1 %vm2418_vm10, %v4923_v61  ;;  %v4476_v7 = vpop.permute.xlu1 %4475 }
 0x3c0   :  { %4389 = vmatpush1.msra.mxu1 %v4236_v4  ;;  %4452 = vmatprep.mubr.f32.mxu1 %v5592_v1  ;;  %v4482_v19 = vsel %vm1072_vm5, %v4474_v9, %v4476_v7  ;;  %v4483_v24 = vsel %vm1072_vm5, %v4476_v7, %v4478_v23 }
 0x3c1   :  { %4493 = vmatprep.subr.mxu1 %v4480_v6 }
 0x3c3   :  { %4926 = vmatmul.mubr.msk.f32.vlgmr.msra.gmra.mrb[4].mxu1 %vm2418_vm10, %v4923_v61  ;;  %v4756_v61 = vld [vmem:[%s5732_s7] sm:$0xff] }
 0x3c4   :  { %4494 = vmatpush1.msra.mxu1 %v4479_v11  ;;  %4557 = vmatprep.mubr.f32.mxu1 %v5592_v1 }
 0x3c5   :  { %4564 = vmatprep.subr.mxu1 %v4482_v19 }
 0x3c7   :  { %4928 = vmatmul.mubr.msk.f32.vlgmr.msra.gmra.mrb[0].mxu1 %vm2418_vm10, %v4927_v21 }
 0x3c8   :  { %4565 = vmatpush1.msra.mxu1 %v4481_v22  ;;  %4628 = vmatprep.mubr.f32.mxu1 %v5592_v1 }
 0x3c9   :  { %4635 = vmatprep.subr.mxu1 %v4478_v23 }
 0x3cb   :  { %4929 = vmatmul.mubr.msk.f32.vlgmr.msra.gmra.mrb[2].mxu1 %vm2418_vm10, %v4927_v21 }
 0x3cc   :  { %4636 = vmatpush1.msra.mxu1 %v4483_v24  ;;  %4699 = vmatprep.mubr.f32.mxu1 %v5592_v1 }
 0x3cf   :  { %4930 = vmatmul.mubr.msk.f32.vlgmr.msra.gmra.mrb[4].mxu1 %vm2418_vm10, %v4927_v21 }
 0x3d0   :  { %v4716_v25 = vpop.permute.xlu1 %4715 }
 0x49a   :  { %v4559_v26 = vpop.f32.mrb[0].mxu1 }
 0x49b   :  { %v4718_v27 = vadd.f32 %v4716_v25, %v4559_v26  ;;  %v4561_v28 = vpop.f32.mrb[1].mxu1 }
 0x49c   :  { %v4719_v29 = vadd.f32 %v4716_v25, %v4561_v28 }
 0x49d   :  { %v4724_v30 = vmul.f32 %v4718_v27, %v5404_v50 }
 0x49e   :  { %v4725_v31 = vmul.f32 %v4719_v29, %v5406_v52  ;;  %v4630_v32 = vpop.f32.mrb[2].mxu1 }
 0x49f   :  { %v4738_v33 = vmul.f32 %v4724_v30, %v4718_v27  ;;  %v4720_v13 = vadd.f32 %v4716_v25, %v4630_v32  ;;  %v4632_v12 = vpop.f32.mrb[3].mxu1 }
 0x4a0   :  { %v4730_v16 = vadd.f32 %v4725_v31, %v4724_v30  ;;  %v4739_v34 = vmul.f32 %v4725_v31, %v4719_v29  ;;  %v4721_v35 = vadd.f32 %v4716_v25, %v4632_v12 }
 0x4a1   :  { %v4726_v1 = vmul.f32 %v4720_v13, %v5412_v57 }
 0x4a2   :  { %v4744_v15 = vadd.f32 %v4739_v34, %v4738_v33  ;;  %v4727_v18 = vmul.f32 %v4721_v35, %v5418_v62  ;;  %v4701_v20 = vpop.f32.mrb[4].mxu1 }
 0x4a3   :  { %v4731_v36 = vadd.f32 %v4730_v16, %v4726_v1  ;;  %v4740_v37 = vmul.f32 %v4726_v1, %v4720_v13  ;;  %v4722_v38 = vadd.f32 %v4716_v25, %v4701_v20  ;;  %v4703_v39 = vpop.f32.mrb[5].mxu1 }
 0x4a4   :  { %v4741_v50 = vmul.f32 %v4727_v18, %v4721_v35  ;;  %v4723_v40 = vadd.f32 %v4716_v25, %v4703_v39 }
 0x4a5   :  { %v4745_v52 = vadd.f32 %v4744_v15, %v4740_v37  ;;  %v4732_v41 = vadd.f32 %v4731_v36, %v4727_v18  ;;  %v4728_v42 = vmul.f32 %v4722_v38, %v5428_v8 }
 0x4a6   :  { %v4729_v43 = vmul.f32 %v4723_v40, %v5430_v10 }
 0x4a7   :  { %v4746_v44 = vadd.f32 %v4745_v52, %v4741_v50  ;;  %v4742_v45 = vmul.f32 %v4728_v42, %v4722_v38  ;;  %v4733_v46 = vadd.f32 %v4732_v41, %v4728_v42 }
 0x4a8   :  { %v4743_v57 = vmul.f32 %v4729_v43, %v4723_v40  ;;  %v4734_v47 = vsel %vm2418_vm10, %v4729_v43, 0.0 }
 0x4a9   :  { %v4735_v62 = vadd.f32 %v4734_v47, %v4733_v46  ;;  %v4747_v48 = vadd.f32 %v4746_v44, %v4742_v45 }
 0x4aa   :  { %v4748_v49 = vsel %vm2418_vm10, %v4743_v57, 0.0 }
 0x4ab   :  { %4736 = vadd.xlane.f32.xlu0 %v4735_v62  ;;  %v4749_v51 = vadd.f32 %v4748_v49, %v4747_v48 }
 0x4ad   :  { %4750 = vadd.xlane.f32.xlu1 %v4749_v51 }
 0x538   :  { %v4737_v53 = vpop.xlane.xlu0 %4736 }
 0x539   :  { %v4752_v55 = vmul.f32 0.001953125, %v4737_v53 }
 0x53a   :  { %v4751_v58 = vpop.xlane.xlu1 %4750 }
 0x53b   :  { %v4754_v59 = vmul.f32 %v4752_v55, %v4752_v55  ;;  %v4753_v8 = vmul.f32 0.001953125, %v4751_v58 }
 0x53d   :  { %v4755_v60 = vsub.f32 %v4753_v8, %v4754_v59 }
 0x53f   :  { %v4757_v10 = vadd.f32 1e-05, %v4755_v60 }
 0x541   :  { %5049 = vrsqrt.f32 %v4757_v10 }
 0x54b   :  { %v5050_v63 = vpop.eup %5049 }
 0x54c   :  { %v4759_v2 = vmul.f32 %v5050_v63, %v4756_v61 }
 0x54e   :  { %4765 = vperm.xlu0 %5042, %v4759_v2   ;;  %v4761_v4 = vmul.f32 %v4759_v2, %v4752_v55 }
 0x550   :  { %v4762_v6 = vsub.f32 %v4760_v3, %v4761_v4 }
 0x552   :  { %4776 = vperm.xlu1 %5043, %v4762_v6  }
 0x5cd   :  { %v4766_v7 = vpop.permute.xlu0 %4765 }
 0x5ce   :  { %v4768_v9 = vmul.f32 %v4766_v7, %v4718_v27  ;;  %v4769_v11 = vmul.f32 %v4766_v7, %v4719_v29  ;;  %v4770_v19 = vmul.f32 %v4766_v7, %v4720_v13  ;;  %v4771_v21 = vmul.f32 %v4766_v7, %v4721_v35 }
 0x5cf   :  { %v4772_v22 = vmul.f32 %v4766_v7, %v4722_v38  ;;  %v4773_v23 = vmul.f32 %v4766_v7, %v4723_v40 }
 0x5d1   :  { %v4777_v24 = vpop.permute.xlu1 %4776 }
 0x5d2   :  { %v4779_v25 = vadd.f32 %v4777_v24, %v4768_v9  ;;  %v4780_v26 = vadd.f32 %v4777_v24, %v4769_v11  ;;  %v4781_v28 = vadd.f32 %v4777_v24, %v4770_v19  ;;  %v4782_v30 = vadd.f32 %v4777_v24, %v4771_v21 }
 0x5d3   :  { %v4783_v31 = vadd.f32 %v4777_v24, %v4772_v22  ;;  %v4784_v32 = vadd.f32 %v4777_v24, %v4773_v23 }
 0x5d4   :  { %v4785_v33 = vadd.f32 %v4779_v25, %v5408_v54  ;;  %v4786_v12 = vadd.f32 %v4780_v26, %v5410_v56  ;;  %v4787_v16 = vadd.f32 %v4781_v28, %v5420_v0  ;;  %v4788_v27 = vadd.f32 %v4782_v30, %v5424_v5 }
 0x5d5   :  { %v4789_v29 = vadd.f32 %v4783_v31, %v5435_v14  ;;  %v4790_v13 = vadd.f32 %v4784_v32, %v5437_v17 }
 0x5d6   :  { %v4791_v34 = vmax.f32 %v4785_v33, 0.0  ;;  %v4792_v35 = vmax.f32 %v4786_v12, 0.0  ;;  %v4793_v1 = vmax.f32 %v4787_v16, 0.0  ;;  %v4794_v15 = vmax.f32 %v4788_v27, 0.0 }
 0x5d7   :  { %v4795_v18 = vmax.f32 %v4789_v29, 0.0  ;;  %v4796_v20 = vmax.f32 %v4790_v13, 0.0 }
 0x5d8   :  { %4797 = vst [vmem:[%s5734_s10] sm:$0xff] %v4791_v34  ;;  %4798 = vst [vmem:[%s5734_s10 + $0x8] sm:$0xff] %v4792_v35 }
 0x5d9   :  { %4799 = vst [vmem:[%s5734_s10 + $0x10] sm:$0xff] %v4793_v1  ;;  %4800 = vst [vmem:[%s5734_s10 + $0x18] sm:$0xff] %v4794_v15 }
 0x5da   :  { %4801 = vst [vmem:[%s5734_s10 + $0x20] sm:$0xff] %v4795_v18  ;;  %4802 = vst.msk [vmem:[%s5734_s10 + $0x28] sm:$0xff] %vm2418_vm10, %v4796_v20 }

</bundles_post_ra>
